<compile_context>
chip_gen: v7x
topology: tpu7x:2x2x1
jax: 0.10.0
libtpu: 0.0.40
codegen_flags: <defaults>
</compile_context>

<pallas_src>
import functools

import jax
import jax.numpy as jnp
from jax.experimental import pallas as pl
from jax.experimental.pallas import tpu as pltpu

LN_EPS = 1e-5

# Lazily probed: whether pipeline_mode=pl.Buffered(1) is accepted for the
# grid-invariant weight blocks on this JAX/Mosaic build.
_SINGLE_BUFFER_WEIGHTS_OK = None
_VMEM_LIMIT_BYTES = None


def _vmem_limit_bytes():
    """Generation-dependent VMEM limit: 3/4 of physical capacity."""
    global _VMEM_LIMIT_BYTES
    if _VMEM_LIMIT_BYTES is None:
        try:
            cap = pltpu.get_tpu_info().vmem_capacity_bytes
        except Exception:
            cap = 64 * 1024 * 1024  # conservative (v7x-sized) fallback
        _VMEM_LIMIT_BYTES = int(cap * 3 // 4)
    return _VMEM_LIMIT_BYTES


def _choose_batch_block(B, S):
    """Batch elements per grid step.

    Fold batch into the matmul M dim when S is small so the MXU rows fill and
    the ~0.35us/step overhead amortizes; keep >=2 grid steps so the v7x
    megacore "parallel" axis has work for both TensorCores.
    """
    if S >= 256 or B <= 1:
        return 1
    target_rows = 512
    best = 1
    for cand in range(1, B + 1):
        if B % cand == 0 and cand * S <= target_rows:
            best = cand
    while best > 1 and B // best < 2:
        best -= 1
        while best > 1 and B % best != 0:
            best -= 1
    return max(best, 1)


def _layernorm(v, g, b):
    # v: (M, H); g, b: (1, H) -- all f32
    mean = jnp.mean(v, axis=-1, keepdims=True)
    var = jnp.mean((v - mean) ** 2, axis=-1, keepdims=True)
    return (v - mean) * jax.lax.rsqrt(var + LN_EPS) * g + b


def encoder_layer_kernel(x_ref, *refs, n_heads, apply_out_ln):
    if apply_out_ln:
        param_refs = refs[:-4]
        outg_ref, outb_ref, x_out_ref, w_out_ref = refs[-4:]
    else:
        param_refs = refs[:-2]
        x_out_ref, w_out_ref = refs[-2:]
        outg_ref = outb_ref = None

    (ln1g_ref, ln1b_ref,
     wqkv_ref, bqkv_ref, wo_ref, bo_ref,
     ln2g_ref, ln2b_ref,
     w1_ref, b1_ref, w2_ref, b2_ref) = param_refs

    x = x_ref[...]                         # (Bb, S, H) f32
    Bb, S, H = x.shape
    dh = H // n_heads
    x2 = x.reshape(Bb * S, H)              # fold batch into matmul M dim

    # ---- preprocess_att: LayerNorm (f32) ----
    y = _layernorm(x2, ln1g_ref[...], ln1b_ref[...])
    y_bf = y.astype(jnp.bfloat16)

    # ---- MultiHeadAttention (q = k = v = y), fused QKV projection ----
    # 1/sqrt(dh) is already folded into the q columns of wqkv / bqkv.
    qkv = (jnp.dot(y_bf, wqkv_ref[...], preferred_element_type=jnp.float32)
           + bqkv_ref[...])                # (Bb*S, 3H) f32
    q = qkv[:, :H]
    k = qkv[:, H:2 * H]
    v = qkv[:, 2 * H:]

    def split_heads(t):                    # (Bb*S, H) -> (Bb*h, S, dh) bf16
        t = t.reshape(Bb, S, n_heads, dh)
        t = jnp.transpose(t, (0, 2, 1, 3))
        return t.reshape(Bb * n_heads, S, dh).astype(jnp.bfloat16)

    qh = split_heads(q)
    kh = split_heads(k)
    vh = split_heads(v)

    # batched-head logits: (Bb*h, S, S), f32
    logits = jnp.einsum('hqd,hkd->hqk', qh, kh,
                        preferred_element_type=jnp.float32)

    # softmax over keys (f32 stats, EUP reciprocal)
    m = jnp.max(logits, axis=-1, keepdims=True)
    e = jnp.exp(logits - m)
    denom = jnp.sum(e, axis=-1, keepdims=True)
    probs = e * pl.reciprocal(denom, approx=True)

    # single lane-dense store of the attention map for this batch block
    w_out_ref[...] = probs.reshape(Bb, n_heads, S, S).astype(w_out_ref.dtype)

    # context: (Bb*h, S, dh) f32 -> (Bb*S, H)
    ctx = jnp.einsum('hqk,hkd->hqd', probs.astype(jnp.bfloat16), vh,
                     preferred_element_type=jnp.float32)
    ctx = jnp.transpose(ctx.reshape(Bb, n_heads, S, dh),
                        (0, 2, 1, 3)).reshape(Bb * S, H)

    att_out = jnp.dot(ctx.astype(jnp.bfloat16), wo_ref[...],
                      preferred_element_type=jnp.float32) + bo_ref[...]

    # ---- residual (dropout = identity) ----
    x2 = att_out + x2

    # ---- preprocess_ffn + FFN ----
    y = _layernorm(x2, ln2g_ref[...], ln2b_ref[...])
    hdn = jnp.maximum(
        jnp.dot(y.astype(jnp.bfloat16), w1_ref[...],
                preferred_element_type=jnp.float32) + b1_ref[...],
        0.0,
    )
    ffn_out = jnp.dot(hdn.astype(jnp.bfloat16), w2_ref[...],
                      preferred_element_type=jnp.float32) + b2_ref[...]

    # ---- residual ----
    x2 = ffn_out + x2

    # ---- fused final (encoder-output) LayerNorm on the last layer ----
    if apply_out_ln:
        x2 = _layernorm(x2, outg_ref[...], outb_ref[...])

    x_out_ref[...] = x2.reshape(Bb, S, H).astype(x_out_ref.dtype)


def _resident_spec(shape, single_buffer):
    """BlockSpec for a grid-invariant (weight/bias) operand."""
    ndim = len(shape)
    idx = lambda b, _nd=ndim: (0,) * _nd
    if single_buffer:
        # Block index never changes across the grid -> one VMEM buffer is
        # enough; halves resident-weight VMEM vs. default double-buffering.
        return pl.BlockSpec(shape, idx, pipeline_mode=pl.Buffered(1))
    return pl.BlockSpec(shape, idx)


_PARAM_ORDER = [
    "ln1_g", "ln1_b",
    "wqkv", "bqkv", "wo", "bo",
    "ln2_g", "ln2_b",
    "w1", "b1", "w2", "b2",
]


def prepare_layer_params(p, n_heads):
    """One-time parameter prep: fuse QKV, fold the 1/sqrt(dh) scale into the
    q projection, and pre-cast matmul weights to bf16 (done once, not per
    forward pass)."""
    H = p["wq"].shape[0]
    dh = H // n_heads
    scale = jnp.float32(dh) ** -0.5
    wqkv = jnp.concatenate([p["wq"] * scale, p["wk"], p["wv"]],
                           axis=1).astype(jnp.bfloat16)          # (H, 3H) bf16
    bqkv = jnp.concatenate([p["bq"] * scale, p["bk"], p["bv"]],
                           axis=1).astype(jnp.float32)           # (1, 3H) f32
    return {
        "ln1_g": p["ln1_g"], "ln1_b": p["ln1_b"],
        "wqkv": wqkv, "bqkv": bqkv,
        "wo": p["wo"].astype(jnp.bfloat16), "bo": p["bo"],
        "ln2_g": p["ln2_g"], "ln2_b": p["ln2_b"],
        "w1": p["w1"].astype(jnp.bfloat16), "b1": p["b1"],
        "w2": p["w2"].astype(jnp.bfloat16), "b2": p["b2"],
    }


def encoder_layer(x, prepped, n_heads, out_g=None, out_b=None,
                  apply_out_ln=False, att_weights_dtype=jnp.bfloat16,
                  batch_block=None):
    global _SINGLE_BUFFER_WEIGHTS_OK
    B, S, H = x.shape
    Bb = batch_block if batch_block is not None else _choose_batch_block(B, S)
    assert B % Bb == 0
    grid = (B // Bb,)

    params = [prepped[name] for name in _PARAM_ORDER]
    if apply_out_ln:
        params += [out_g, out_b]

    out_specs = (
        pl.BlockSpec((Bb, S, H), lambda b: (b, 0, 0)),
        pl.BlockSpec((Bb, n_heads, S, S), lambda b: (b, 0, 0, 0)),
    )
    out_shapes = (
        jax.ShapeDtypeStruct((B, S, H), jnp.float32),
        jax.ShapeDtypeStruct((B, n_heads, S, S), att_weights_dtype),
    )

    kernel = functools.partial(
        encoder_layer_kernel, n_heads=n_heads, apply_out_ln=apply_out_ln
    )

    def _call(single_buffer_weights):
        in_specs = [pl.BlockSpec((Bb, S, H), lambda b: (b, 0, 0))]
        in_specs += [_resident_spec(a.shape, single_buffer_weights)
                     for a in params]
        return pl.pallas_call(
            kernel,
            out_shape=out_shapes,
            grid=grid,
            in_specs=in_specs,
            out_specs=out_specs,
            compiler_params=pltpu.CompilerParams(
                dimension_semantics=("parallel",),
                vmem_limit_bytes=_vmem_limit_bytes(),
            ),
        )(x, *params)

    if _SINGLE_BUFFER_WEIGHTS_OK is None:
        try:
            res = _call(True)
            _SINGLE_BUFFER_WEIGHTS_OK = True
            return res
        except Exception:
            # pipeline_mode=pl.Buffered(1) unsupported on this build; fall
            # back to default (double-buffered) weight specs.
            _SINGLE_BUFFER_WEIGHTS_OK = False
            return _call(False)
    return _call(_SINGLE_BUFFER_WEIGHTS_OK)


def encoder_forward(x, prepared_layer_params, out_g, out_b, n_heads,
                    att_weights_dtype=jnp.bfloat16):
    attention_list = []
    n_layers = len(prepared_layer_params)
    for i, p in enumerate(prepared_layer_params):
        last = (i == n_layers - 1)
        x, weights = encoder_layer(
            x, p, n_heads,
            out_g=out_g if last else None,
            out_b=out_b if last else None,
            apply_out_ln=last,
            att_weights_dtype=att_weights_dtype,
        )
        attention_list.append(weights)
    return x, attention_list


def init_layer_params(key, hidden_dim, filter_size):
    ks = jax.random.split(key, 8)

    def lin(k, fan_in, shape):
        return jax.random.normal(k, shape, jnp.float32) / jnp.sqrt(fan_in)

    H, F = hidden_dim, filter_size
    return {
        "ln1_g": jnp.ones((1, H), jnp.float32),
        "ln1_b": jnp.zeros((1, H), jnp.float32),
        "wq": lin(ks[0], H, (H, H)), "bq": jnp.zeros((1, H), jnp.float32),
        "wk": lin(ks[1], H, (H, H)), "bk": jnp.zeros((1, H), jnp.float32),
        "wv": lin(ks[2], H, (H, H)), "bv": jnp.zeros((1, H), jnp.float32),
        "wo": lin(ks[3], H, (H, H)), "bo": jnp.zeros((1, H), jnp.float32),
        "ln2_g": jnp.ones((1, H), jnp.float32),
        "ln2_b": jnp.zeros((1, H), jnp.float32),
        "w1": lin(ks[4], H, (H, F)), "b1": jnp.zeros((1, F), jnp.float32),
        "w2": lin(ks[5], F, (F, H)), "b2": jnp.zeros((1, H), jnp.float32),
    }


if __name__ == "__main__":
    n_layers = 2
    B, S, H = 2, 8, 32
    n_heads = 4
    filter_size = 64

    root = jax.random.PRNGKey(0)
    k_x, *k_layers = jax.random.split(root, 1 + n_layers)
    x = jax.random.normal(k_x, (B, S, H), jnp.float32)

    raw_params = [init_layer_params(k, H, filter_size) for k in k_layers]
    prepared = [prepare_layer_params(p, n_heads) for p in raw_params]
    out_g = jnp.ones((1, H), jnp.float32)
    out_b = jnp.zeros((1, H), jnp.float32)

    out, att_list = encoder_forward(x, prepared, out_g, out_b, n_heads)
    out = jax.block_until_ready(out)
    att_list = [jax.block_until_ready(a) for a in att_list]

    assert out.shape == (B, S, H)
    assert len(att_list) == n_layers
    assert all(a.shape == (B, n_heads, S, S) for a in att_list)
    assert bool(jnp.all(jnp.isfinite(out)))
    assert all(bool(jnp.all(jnp.isfinite(a.astype(jnp.float32))))
               for a in att_list)
    print("KERNEL_OK")
</pallas_src>

<mosaic_0001>
module attributes {stable_mosaic.version = 11 : i64} {
  func.func @encoder_layer_kernel(%arg0: i32, %arg1: memref<1x8x32xf32, #tpu.memory_space<vmem>>, %arg2: memref<1x32xf32, #tpu.memory_space<vmem>>, %arg3: memref<1x32xf32, #tpu.memory_space<vmem>>, %arg4: memref<32x96xbf16, #tpu.memory_space<vmem>>, %arg5: memref<1x96xf32, #tpu.memory_space<vmem>>, %arg6: memref<32x32xbf16, #tpu.memory_space<vmem>>, %arg7: memref<1x32xf32, #tpu.memory_space<vmem>>, %arg8: memref<1x32xf32, #tpu.memory_space<vmem>>, %arg9: memref<1x32xf32, #tpu.memory_space<vmem>>, %arg10: memref<32x64xbf16, #tpu.memory_space<vmem>>, %arg11: memref<1x64xf32, #tpu.memory_space<vmem>>, %arg12: memref<64x32xbf16, #tpu.memory_space<vmem>>, %arg13: memref<1x32xf32, #tpu.memory_space<vmem>>, %arg14: memref<1x8x32xf32, #tpu.memory_space<vmem>>, %arg15: memref<1x4x8x8xbf16, #tpu.memory_space<vmem>>) attributes {dimension_semantics = [#tpu.dimension_semantics<parallel>], iteration_bounds = array<i64: 2>, scalar_prefetch = 0 : i64, scratch_operands = 0 : i64, tpu.core_type = #tpu.core_type<tc>, window_params = [{transform_indices = @transform_0, window_bounds = array<i64: 1, 8, 32>}, {pipeline_mode = #tpu.pipeline_mode<synchronous>, transform_indices = @transform_1, window_bounds = array<i64: 1, 32>}, {pipeline_mode = #tpu.pipeline_mode<synchronous>, transform_indices = @transform_2, window_bounds = array<i64: 1, 32>}, {pipeline_mode = #tpu.pipeline_mode<synchronous>, transform_indices = @transform_3, window_bounds = array<i64: 32, 96>}, {pipeline_mode = #tpu.pipeline_mode<synchronous>, transform_indices = @transform_4, window_bounds = array<i64: 1, 96>}, {pipeline_mode = #tpu.pipeline_mode<synchronous>, transform_indices = @transform_5, window_bounds = array<i64: 32, 32>}, {pipeline_mode = #tpu.pipeline_mode<synchronous>, transform_indices = @transform_6, window_bounds = array<i64: 1, 32>}, {pipeline_mode = #tpu.pipeline_mode<synchronous>, transform_indices = @transform_7, window_bounds = array<i64: 1, 32>}, {pipeline_mode = #tpu.pipeline_mode<synchronous>, transform_indices = @transform_8, window_bounds = array<i64: 1, 32>}, {pipeline_mode = #tpu.pipeline_mode<synchronous>, transform_indices = @transform_9, window_bounds = array<i64: 32, 64>}, {pipeline_mode = #tpu.pipeline_mode<synchronous>, transform_indices = @transform_10, window_bounds = array<i64: 1, 64>}, {pipeline_mode = #tpu.pipeline_mode<synchronous>, transform_indices = @transform_11, window_bounds = array<i64: 64, 32>}, {pipeline_mode = #tpu.pipeline_mode<synchronous>, transform_indices = @transform_12, window_bounds = array<i64: 1, 32>}, {transform_indices = @transform_13, window_bounds = array<i64: 1, 8, 32>}, {transform_indices = @transform_14, window_bounds = array<i64: 1, 4, 8, 8>}]} {
    %c0 = arith.constant 0 : index
    %c0_0 = arith.constant 0 : index
    %c0_1 = arith.constant 0 : index
    %0 = vector.load %arg1[%c0, %c0_0, %c0_1] : memref<1x8x32xf32, #tpu.memory_space<vmem>>, vector<1x8x32xf32>
    %1 = vector.shape_cast %0 : vector<1x8x32xf32> to vector<8x32xf32>
    %c0_2 = arith.constant 0 : index
    %c0_3 = arith.constant 0 : index
    %2 = vector.load %arg2[%c0_2, %c0_3] : memref<1x32xf32, #tpu.memory_space<vmem>>, vector<1x32xf32>
    %c0_4 = arith.constant 0 : index
    %c0_5 = arith.constant 0 : index
    %3 = vector.load %arg3[%c0_4, %c0_5] : memref<1x32xf32, #tpu.memory_space<vmem>>, vector<1x32xf32>
    %cst = arith.constant dense<0.000000e+00> : vector<8xf32>
    %4 = vector.multi_reduction <add>, %1, %cst [1] : vector<8x32xf32> to vector<8xf32>
    %5 = vector.shape_cast %4 : vector<8xf32> to vector<8x1xf32>
    %cst_6 = arith.constant 3.200000e+01 : f32
    %6 = vector.broadcast %cst_6 : f32 to vector<8x1xf32>
    %7 = arith.divf %5, %6 : vector<8x1xf32>
    %8 = vector.broadcast %7 : vector<8x1xf32> to vector<8x32xf32>
    %9 = arith.subf %1, %8 : vector<8x32xf32>
    %10 = arith.mulf %9, %9 : vector<8x32xf32>
    %cst_7 = arith.constant dense<0.000000e+00> : vector<8xf32>
    %11 = vector.multi_reduction <add>, %10, %cst_7 [1] : vector<8x32xf32> to vector<8xf32>
    %12 = vector.shape_cast %11 : vector<8xf32> to vector<8x1xf32>
    %cst_8 = arith.constant 3.200000e+01 : f32
    %13 = vector.broadcast %cst_8 : f32 to vector<8x1xf32>
    %14 = arith.divf %12, %13 : vector<8x1xf32>
    %15 = vector.broadcast %7 : vector<8x1xf32> to vector<8x32xf32>
    %16 = arith.subf %1, %15 : vector<8x32xf32>
    %cst_9 = arith.constant 9.99999974E-6 : f32
    %17 = vector.broadcast %cst_9 : f32 to vector<8x1xf32>
    %18 = arith.addf %14, %17 : vector<8x1xf32>
    %19 = math.rsqrt %18 : vector<8x1xf32>
    %20 = vector.broadcast %19 : vector<8x1xf32> to vector<8x32xf32>
    %21 = arith.mulf %16, %20 : vector<8x32xf32>
    %22 = vector.broadcast %2 : vector<1x32xf32> to vector<8x32xf32>
    %23 = arith.mulf %21, %22 : vector<8x32xf32>
    %24 = vector.broadcast %3 : vector<1x32xf32> to vector<8x32xf32>
    %25 = arith.addf %23, %24 : vector<8x32xf32>
    %26 = arith.truncf %25 : vector<8x32xf32> to vector<8x32xbf16>
    %c0_10 = arith.constant 0 : index
    %c0_11 = arith.constant 0 : index
    %27 = vector.load %arg4[%c0_10, %c0_11] : memref<32x96xbf16, #tpu.memory_space<vmem>>, vector<32x96xbf16>
    %cst_12 = arith.constant dense<0.000000e+00> : vector<8x96xf32>
    %28 = tpu.matmul %26, %27, %cst_12 {dimension_numbers = #tpu.dot_dimension_numbers<[1], [0], [0], [1], [0, 0, 1, 1], [], []>} : vector<8x32xbf16>, vector<32x96xbf16>, vector<8x96xf32> -> vector<8x96xf32>
    %c0_13 = arith.constant 0 : index
    %c0_14 = arith.constant 0 : index
    %29 = vector.load %arg5[%c0_13, %c0_14] : memref<1x96xf32, #tpu.memory_space<vmem>>, vector<1x96xf32>
    %30 = vector.broadcast %29 : vector<1x96xf32> to vector<8x96xf32>
    %31 = arith.addf %28, %30 : vector<8x96xf32>
    %32 = vector.extract_strided_slice %31 {offsets = [0, 0], sizes = [8, 32], strides = [1, 1]} : vector<8x96xf32> to vector<8x32xf32>
    %33 = vector.extract_strided_slice %31 {offsets = [0, 32], sizes = [8, 32], strides = [1, 1]} : vector<8x96xf32> to vector<8x32xf32>
    %34 = vector.extract_strided_slice %31 {offsets = [0, 64], sizes = [8, 32], strides = [1, 1]} : vector<8x96xf32> to vector<8x32xf32>
    %35 = vector.shape_cast %32 : vector<8x32xf32> to vector<1x8x4x8xf32>
    %36 = tpu.transpose %35, [0, 2, 1, 3] : vector<1x8x4x8xf32> -> vector<1x4x8x8xf32>
    %37 = vector.shape_cast %36 : vector<1x4x8x8xf32> to vector<4x8x8xf32>
    %38 = arith.truncf %37 : vector<4x8x8xf32> to vector<4x8x8xbf16>
    %39 = vector.shape_cast %33 : vector<8x32xf32> to vector<1x8x4x8xf32>
    %40 = tpu.transpose %39, [0, 2, 1, 3] : vector<1x8x4x8xf32> -> vector<1x4x8x8xf32>
    %41 = vector.shape_cast %40 : vector<1x4x8x8xf32> to vector<4x8x8xf32>
    %42 = arith.truncf %41 : vector<4x8x8xf32> to vector<4x8x8xbf16>
    %43 = vector.shape_cast %34 : vector<8x32xf32> to vector<1x8x4x8xf32>
    %44 = tpu.transpose %43, [0, 2, 1, 3] : vector<1x8x4x8xf32> -> vector<1x4x8x8xf32>
    %45 = vector.shape_cast %44 : vector<1x4x8x8xf32> to vector<4x8x8xf32>
    %46 = arith.truncf %45 : vector<4x8x8xf32> to vector<4x8x8xbf16>
    "tpu.trace_start"() <{level = 10 : i32, message = "hqd,hkd->hqk"}> : () -> ()
    %cst_15 = arith.constant dense<0.000000e+00> : vector<4x8x8xf32>
    %47 = tpu.matmul %38, %42, %cst_15 {dimension_numbers = #tpu.dot_dimension_numbers<[2], [2], [1], [1], [0, 0, 0, 1, 1, 1], [0], [0]>} : vector<4x8x8xbf16>, vector<4x8x8xbf16>, vector<4x8x8xf32> -> vector<4x8x8xf32>
    "tpu.trace_stop"() : () -> ()
    %cst_16 = arith.constant dense<0xFF800000> : vector<4x8xf32>
    %48 = vector.multi_reduction <maximumf>, %47, %cst_16 [2] : vector<4x8x8xf32> to vector<4x8xf32>
    %49 = vector.shape_cast %48 : vector<4x8xf32> to vector<4x8x1xf32>
    %50 = vector.broadcast %49 : vector<4x8x1xf32> to vector<4x8x8xf32>
    %51 = arith.subf %47, %50 : vector<4x8x8xf32>
    %52 = math.exp %51 : vector<4x8x8xf32>
    %cst_17 = arith.constant dense<0.000000e+00> : vector<4x8xf32>
    %53 = vector.multi_reduction <add>, %52, %cst_17 [2] : vector<4x8x8xf32> to vector<4x8xf32>
    %54 = vector.shape_cast %53 : vector<4x8xf32> to vector<4x8x1xf32>
    %55 = tpu.reciprocal %54 {approx = true} : vector<4x8x1xf32> -> vector<4x8x1xf32>
    %56 = vector.broadcast %55 : vector<4x8x1xf32> to vector<4x8x8xf32>
    %57 = arith.mulf %52, %56 : vector<4x8x8xf32>
    %58 = vector.shape_cast %57 : vector<4x8x8xf32> to vector<1x4x8x8xf32>
    %59 = arith.truncf %58 : vector<1x4x8x8xf32> to vector<1x4x8x8xbf16>
    %c0_18 = arith.constant 0 : index
    %c0_19 = arith.constant 0 : index
    %c0_20 = arith.constant 0 : index
    %c0_21 = arith.constant 0 : index
    %60 = vector.load %arg15[%c0_18, %c0_19, %c0_20, %c0_21] : memref<1x4x8x8xbf16, #tpu.memory_space<vmem>>, vector<1x4x8x8xbf16>
    tpu.vector_store %arg15[%c0_18, %c0_19, %c0_20, %c0_21], %59 {strides = array<i32>} : memref<1x4x8x8xbf16, #tpu.memory_space<vmem>>, vector<1x4x8x8xbf16>,
    %61 = arith.truncf %57 : vector<4x8x8xf32> to vector<4x8x8xbf16>
    "tpu.trace_start"() <{level = 10 : i32, message = "hqk,hkd->hqd"}> : () -> ()
    %cst_22 = arith.constant dense<0.000000e+00> : vector<4x8x8xf32>
    %62 = tpu.matmul %61, %46, %cst_22 {dimension_numbers = #tpu.dot_dimension_numbers<[2], [1], [1], [2], [0, 0, 0, 1, 1, 2], [0], [0]>} : vector<4x8x8xbf16>, vector<4x8x8xbf16>, vector<4x8x8xf32> -> vector<4x8x8xf32>
    "tpu.trace_stop"() : () -> ()
    %63 = vector.shape_cast %62 : vector<4x8x8xf32> to vector<1x4x8x8xf32>
    %64 = tpu.transpose %63, [0, 2, 1, 3] : vector<1x4x8x8xf32> -> vector<1x8x4x8xf32>
    %65 = vector.shape_cast %64 : vector<1x8x4x8xf32> to vector<8x32xf32>
    %66 = arith.truncf %65 : vector<8x32xf32> to vector<8x32xbf16>
    %c0_23 = arith.constant 0 : index
    %c0_24 = arith.constant 0 : index
    %67 = vector.load %arg6[%c0_23, %c0_24] : memref<32x32xbf16, #tpu.memory_space<vmem>>, vector<32x32xbf16>
    %cst_25 = arith.constant dense<0.000000e+00> : vector<8x32xf32>
    %68 = tpu.matmul %66, %67, %cst_25 {dimension_numbers = #tpu.dot_dimension_numbers<[1], [0], [0], [1], [0, 0, 1, 1], [], []>} : vector<8x32xbf16>, vector<32x32xbf16>, vector<8x32xf32> -> vector<8x32xf32>
    %c0_26 = arith.constant 0 : index
    %c0_27 = arith.constant 0 : index
    %69 = vector.load %arg7[%c0_26, %c0_27] : memref<1x32xf32, #tpu.memory_space<vmem>>, vector<1x32xf32>
    %70 = vector.broadcast %69 : vector<1x32xf32> to vector<8x32xf32>
    %71 = arith.addf %68, %70 : vector<8x32xf32>
    %72 = arith.addf %71, %1 : vector<8x32xf32>
    %c0_28 = arith.constant 0 : index
    %c0_29 = arith.constant 0 : index
    %73 = vector.load %arg8[%c0_28, %c0_29] : memref<1x32xf32, #tpu.memory_space<vmem>>, vector<1x32xf32>
    %c0_30 = arith.constant 0 : index
    %c0_31 = arith.constant 0 : index
    %74 = vector.load %arg9[%c0_30, %c0_31] : memref<1x32xf32, #tpu.memory_space<vmem>>, vector<1x32xf32>
    %cst_32 = arith.constant dense<0.000000e+00> : vector<8xf32>
    %75 = vector.multi_reduction <add>, %72, %cst_32 [1] : vector<8x32xf32> to vector<8xf32>
    %76 = vector.shape_cast %75 : vector<8xf32> to vector<8x1xf32>
    %cst_33 = arith.constant 3.200000e+01 : f32
    %77 = vector.broadcast %cst_33 : f32 to vector<8x1xf32>
    %78 = arith.divf %76, %77 : vector<8x1xf32>
    %79 = vector.broadcast %78 : vector<8x1xf32> to vector<8x32xf32>
    %80 = arith.subf %72, %79 : vector<8x32xf32>
    %81 = arith.mulf %80, %80 : vector<8x32xf32>
    %cst_34 = arith.constant dense<0.000000e+00> : vector<8xf32>
    %82 = vector.multi_reduction <add>, %81, %cst_34 [1] : vector<8x32xf32> to vector<8xf32>
    %83 = vector.shape_cast %82 : vector<8xf32> to vector<8x1xf32>
    %cst_35 = arith.constant 3.200000e+01 : f32
    %84 = vector.broadcast %cst_35 : f32 to vector<8x1xf32>
    %85 = arith.divf %83, %84 : vector<8x1xf32>
    %86 = vector.broadcast %78 : vector<8x1xf32> to vector<8x32xf32>
    %87 = arith.subf %72, %86 : vector<8x32xf32>
    %cst_36 = arith.constant 9.99999974E-6 : f32
    %88 = vector.broadcast %cst_36 : f32 to vector<8x1xf32>
    %89 = arith.addf %85, %88 : vector<8x1xf32>
    %90 = math.rsqrt %89 : vector<8x1xf32>
    %91 = vector.broadcast %90 : vector<8x1xf32> to vector<8x32xf32>
    %92 = arith.mulf %87, %91 : vector<8x32xf32>
    %93 = vector.broadcast %73 : vector<1x32xf32> to vector<8x32xf32>
    %94 = arith.mulf %92, %93 : vector<8x32xf32>
    %95 = vector.broadcast %74 : vector<1x32xf32> to vector<8x32xf32>
    %96 = arith.addf %94, %95 : vector<8x32xf32>
    %97 = arith.truncf %96 : vector<8x32xf32> to vector<8x32xbf16>
    %c0_37 = arith.constant 0 : index
    %c0_38 = arith.constant 0 : index
    %98 = vector.load %arg10[%c0_37, %c0_38] : memref<32x64xbf16, #tpu.memory_space<vmem>>, vector<32x64xbf16>
    %cst_39 = arith.constant dense<0.000000e+00> : vector<8x64xf32>
    %99 = tpu.matmul %97, %98, %cst_39 {dimension_numbers = #tpu.dot_dimension_numbers<[1], [0], [0], [1], [0, 0, 1, 1], [], []>} : vector<8x32xbf16>, vector<32x64xbf16>, vector<8x64xf32> -> vector<8x64xf32>
    %c0_40 = arith.constant 0 : index
    %c0_41 = arith.constant 0 : index
    %100 = vector.load %arg11[%c0_40, %c0_41] : memref<1x64xf32, #tpu.memory_space<vmem>>, vector<1x64xf32>
    %101 = vector.broadcast %100 : vector<1x64xf32> to vector<8x64xf32>
    %102 = arith.addf %99, %101 : vector<8x64xf32>
    %cst_42 = arith.constant 0.000000e+00 : f32
    %103 = vector.broadcast %cst_42 : f32 to vector<8x64xf32>
    %104 = arith.maximumf %102, %103 : vector<8x64xf32>
    %105 = arith.truncf %104 : vector<8x64xf32> to vector<8x64xbf16>
    %c0_43 = arith.constant 0 : index
    %c0_44 = arith.constant 0 : index
    %106 = vector.load %arg12[%c0_43, %c0_44] : memref<64x32xbf16, #tpu.memory_space<vmem>>, vector<64x32xbf16>
    %cst_45 = arith.constant dense<0.000000e+00> : vector<8x32xf32>
    %107 = tpu.matmul %105, %106, %cst_45 {dimension_numbers = #tpu.dot_dimension_numbers<[1], [0], [0], [1], [0, 0, 1, 1], [], []>} : vector<8x64xbf16>, vector<64x32xbf16>, vector<8x32xf32> -> vector<8x32xf32>
    %c0_46 = arith.constant 0 : index
    %c0_47 = arith.constant 0 : index
    %108 = vector.load %arg13[%c0_46, %c0_47] : memref<1x32xf32, #tpu.memory_space<vmem>>, vector<1x32xf32>
    %109 = vector.broadcast %108 : vector<1x32xf32> to vector<8x32xf32>
    %110 = arith.addf %107, %109 : vector<8x32xf32>
    %111 = arith.addf %110, %72 : vector<8x32xf32>
    %112 = vector.shape_cast %111 : vector<8x32xf32> to vector<1x8x32xf32>
    %c0_48 = arith.constant 0 : index
    %c0_49 = arith.constant 0 : index
    %c0_50 = arith.constant 0 : index
    %113 = vector.load %arg14[%c0_48, %c0_49, %c0_50] : memref<1x8x32xf32, #tpu.memory_space<vmem>>, vector<1x8x32xf32>
    tpu.vector_store %arg14[%c0_48, %c0_49, %c0_50], %112 {strides = array<i32>} : memref<1x8x32xf32, #tpu.memory_space<vmem>>, vector<1x8x32xf32>,
    return
  }
  func.func @transform_0(%arg0: i32) -> (i32, i32, i32) {
    %c0_i32 = arith.constant 0 : i32
    %c0_i32_0 = arith.constant 0 : i32
    %c0_i32_1 = arith.constant 0 : i32
    return %arg0, %c0_i32, %c0_i32_0 : i32, i32, i32
  }
  func.func @transform_1(%arg0: i32) -> (i32, i32) {
    %c0_i32 = arith.constant 0 : i32
    %c0_i32_0 = arith.constant 0 : i32
    %c0_i32_1 = arith.constant 0 : i32
    return %c0_i32, %c0_i32_0 : i32, i32
  }
  func.func @transform_2(%arg0: i32) -> (i32, i32) {
    %c0_i32 = arith.constant 0 : i32
    %c0_i32_0 = arith.constant 0 : i32
    %c0_i32_1 = arith.constant 0 : i32
    return %c0_i32, %c0_i32_0 : i32, i32
  }
  func.func @transform_3(%arg0: i32) -> (i32, i32) {
    %c0_i32 = arith.constant 0 : i32
    %c0_i32_0 = arith.constant 0 : i32
    %c0_i32_1 = arith.constant 0 : i32
    return %c0_i32, %c0_i32_0 : i32, i32
  }
  func.func @transform_4(%arg0: i32) -> (i32, i32) {
    %c0_i32 = arith.constant 0 : i32
    %c0_i32_0 = arith.constant 0 : i32
    %c0_i32_1 = arith.constant 0 : i32
    return %c0_i32, %c0_i32_0 : i32, i32
  }
  func.func @transform_5(%arg0: i32) -> (i32, i32) {
    %c0_i32 = arith.constant 0 : i32
    %c0_i32_0 = arith.constant 0 : i32
    %c0_i32_1 = arith.constant 0 : i32
    return %c0_i32, %c0_i32_0 : i32, i32
  }
  func.func @transform_6(%arg0: i32) -> (i32, i32) {
    %c0_i32 = arith.constant 0 : i32
    %c0_i32_0 = arith.constant 0 : i32
    %c0_i32_1 = arith.constant 0 : i32
    return %c0_i32, %c0_i32_0 : i32, i32
  }
  func.func @transform_7(%arg0: i32) -> (i32, i32) {
    %c0_i32 = arith.constant 0 : i32
    %c0_i32_0 = arith.constant 0 : i32
    %c0_i32_1 = arith.constant 0 : i32
    return %c0_i32, %c0_i32_0 : i32, i32
  }
  func.func @transform_8(%arg0: i32) -> (i32, i32) {
    %c0_i32 = arith.constant 0 : i32
    %c0_i32_0 = arith.constant 0 : i32
    %c0_i32_1 = arith.constant 0 : i32
    return %c0_i32, %c0_i32_0 : i32, i32
  }
  func.func @transform_9(%arg0: i32) -> (i32, i32) {
    %c0_i32 = arith.constant 0 : i32
    %c0_i32_0 = arith.constant 0 : i32
    %c0_i32_1 = arith.constant 0 : i32
    return %c0_i32, %c0_i32_0 : i32, i32
  }
  func.func @transform_10(%arg0: i32) -> (i32, i32) {
    %c0_i32 = arith.constant 0 : i32
    %c0_i32_0 = arith.constant 0 : i32
    %c0_i32_1 = arith.constant 0 : i32
    return %c0_i32, %c0_i32_0 : i32, i32
  }
  func.func @transform_11(%arg0: i32) -> (i32, i32) {
    %c0_i32 = arith.constant 0 : i32
    %c0_i32_0 = arith.constant 0 : i32
    %c0_i32_1 = arith.constant 0 : i32
    return %c0_i32, %c0_i32_0 : i32, i32
  }
  func.func @transform_12(%arg0: i32) -> (i32, i32) {
    %c0_i32 = arith.constant 0 : i32
    %c0_i32_0 = arith.constant 0 : i32
    %c0_i32_1 = arith.constant 0 : i32
    return %c0_i32, %c0_i32_0 : i32, i32
  }
  func.func @transform_13(%arg0: i32) -> (i32, i32, i32) {
    %c0_i32 = arith.constant 0 : i32
    %c0_i32_0 = arith.constant 0 : i32
    %c0_i32_1 = arith.constant 0 : i32
    return %arg0, %c0_i32, %c0_i32_0 : i32, i32, i32
  }
  func.func @transform_14(%arg0: i32) -> (i32, i32, i32, i32) {
    %c0_i32 = arith.constant 0 : i32
    %c0_i32_0 = arith.constant 0 : i32
    %c0_i32_1 = arith.constant 0 : i32
    %c0_i32_2 = arith.constant 0 : i32
    return %arg0, %c0_i32, %c0_i32_0, %c0_i32_1 : i32, i32, i32, i32
  }
}

module attributes {stable_mosaic.version = 11 : i64} {
  func.func @encoder_layer_kernel(%arg0: i32, %arg1: memref<1x8x32xf32, #tpu.memory_space<vmem>>, %arg2: memref<1x32xf32, #tpu.memory_space<vmem>>, %arg3: memref<1x32xf32, #tpu.memory_space<vmem>>, %arg4: memref<32x96xbf16, #tpu.memory_space<vmem>>, %arg5: memref<1x96xf32, #tpu.memory_space<vmem>>, %arg6: memref<32x32xbf16, #tpu.memory_space<vmem>>, %arg7: memref<1x32xf32, #tpu.memory_space<vmem>>, %arg8: memref<1x32xf32, #tpu.memory_space<vmem>>, %arg9: memref<1x32xf32, #tpu.memory_space<vmem>>, %arg10: memref<32x64xbf16, #tpu.memory_space<vmem>>, %arg11: memref<1x64xf32, #tpu.memory_space<vmem>>, %arg12: memref<64x32xbf16, #tpu.memory_space<vmem>>, %arg13: memref<1x32xf32, #tpu.memory_space<vmem>>, %arg14: memref<1x8x32xf32, #tpu.memory_space<vmem>>, %arg15: memref<1x4x8x8xbf16, #tpu.memory_space<vmem>>) attributes {dimension_semantics = [#tpu.dimension_semantics<parallel>], iteration_bounds = array<i64: 2>, scalar_prefetch = 0 : i64, scratch_operands = 0 : i64, tpu.core_type = #tpu.core_type<tc>, window_params = [{transform_indices = @transform_0, window_bounds = array<i64: 1, 8, 32>}, {pipeline_mode = #tpu.pipeline_mode<synchronous>, transform_indices = @transform_1, window_bounds = array<i64: 1, 32>}, {pipeline_mode = #tpu.pipeline_mode<synchronous>, transform_indices = @transform_2, window_bounds = array<i64: 1, 32>}, {pipeline_mode = #tpu.pipeline_mode<synchronous>, transform_indices = @transform_3, window_bounds = array<i64: 32, 96>}, {pipeline_mode = #tpu.pipeline_mode<synchronous>, transform_indices = @transform_4, window_bounds = array<i64: 1, 96>}, {pipeline_mode = #tpu.pipeline_mode<synchronous>, transform_indices = @transform_5, window_bounds = array<i64: 32, 32>}, {pipeline_mode = #tpu.pipeline_mode<synchronous>, transform_indices = @transform_6, window_bounds = array<i64: 1, 32>}, {pipeline_mode = #tpu.pipeline_mode<synchronous>, transform_indices = @transform_7, window_bounds = array<i64: 1, 32>}, {pipeline_mode = #tpu.pipeline_mode<synchronous>, transform_indices = @transform_8, window_bounds = array<i64: 1, 32>}, {pipeline_mode = #tpu.pipeline_mode<synchronous>, transform_indices = @transform_9, window_bounds = array<i64: 32, 64>}, {pipeline_mode = #tpu.pipeline_mode<synchronous>, transform_indices = @transform_10, window_bounds = array<i64: 1, 64>}, {pipeline_mode = #tpu.pipeline_mode<synchronous>, transform_indices = @transform_11, window_bounds = array<i64: 64, 32>}, {pipeline_mode = #tpu.pipeline_mode<synchronous>, transform_indices = @transform_12, window_bounds = array<i64: 1, 32>}, {transform_indices = @transform_13, window_bounds = array<i64: 1, 8, 32>}, {transform_indices = @transform_14, window_bounds = array<i64: 1, 4, 8, 8>}]} {
    %c0 = arith.constant 0 : index
    %c0_0 = arith.constant 0 : index
    %c0_1 = arith.constant 0 : index
    %0 = vector.load %arg1[%c0, %c0_0, %c0_1] : memref<1x8x32xf32, #tpu.memory_space<vmem>>, vector<1x8x32xf32>
    %1 = vector.shape_cast %0 : vector<1x8x32xf32> to vector<8x32xf32>
    %c0_2 = arith.constant 0 : index
    %c0_3 = arith.constant 0 : index
    %2 = vector.load %arg2[%c0_2, %c0_3] : memref<1x32xf32, #tpu.memory_space<vmem>>, vector<1x32xf32>
    %c0_4 = arith.constant 0 : index
    %c0_5 = arith.constant 0 : index
    %3 = vector.load %arg3[%c0_4, %c0_5] : memref<1x32xf32, #tpu.memory_space<vmem>>, vector<1x32xf32>
    %cst = arith.constant dense<0.000000e+00> : vector<8xf32>
    %4 = vector.multi_reduction <add>, %1, %cst [1] : vector<8x32xf32> to vector<8xf32>
    %5 = vector.shape_cast %4 : vector<8xf32> to vector<8x1xf32>
    %cst_6 = arith.constant 3.200000e+01 : f32
    %6 = vector.broadcast %cst_6 : f32 to vector<8x1xf32>
    %7 = arith.divf %5, %6 : vector<8x1xf32>
    %8 = vector.broadcast %7 : vector<8x1xf32> to vector<8x32xf32>
    %9 = arith.subf %1, %8 : vector<8x32xf32>
    %10 = arith.mulf %9, %9 : vector<8x32xf32>
    %cst_7 = arith.constant dense<0.000000e+00> : vector<8xf32>
    %11 = vector.multi_reduction <add>, %10, %cst_7 [1] : vector<8x32xf32> to vector<8xf32>
    %12 = vector.shape_cast %11 : vector<8xf32> to vector<8x1xf32>
    %cst_8 = arith.constant 3.200000e+01 : f32
    %13 = vector.broadcast %cst_8 : f32 to vector<8x1xf32>
    %14 = arith.divf %12, %13 : vector<8x1xf32>
    %15 = vector.broadcast %7 : vector<8x1xf32> to vector<8x32xf32>
    %16 = arith.subf %1, %15 : vector<8x32xf32>
    %cst_9 = arith.constant 9.99999974E-6 : f32
    %17 = vector.broadcast %cst_9 : f32 to vector<8x1xf32>
    %18 = arith.addf %14, %17 : vector<8x1xf32>
    %19 = math.rsqrt %18 : vector<8x1xf32>
    %20 = vector.broadcast %19 : vector<8x1xf32> to vector<8x32xf32>
    %21 = arith.mulf %16, %20 : vector<8x32xf32>
    %22 = vector.broadcast %2 : vector<1x32xf32> to vector<8x32xf32>
    %23 = arith.mulf %21, %22 : vector<8x32xf32>
    %24 = vector.broadcast %3 : vector<1x32xf32> to vector<8x32xf32>
    %25 = arith.addf %23, %24 : vector<8x32xf32>
    %26 = arith.truncf %25 : vector<8x32xf32> to vector<8x32xbf16>
    %c0_10 = arith.constant 0 : index
    %c0_11 = arith.constant 0 : index
    %27 = vector.load %arg4[%c0_10, %c0_11] : memref<32x96xbf16, #tpu.memory_space<vmem>>, vector<32x96xbf16>
    %cst_12 = arith.constant dense<0.000000e+00> : vector<8x96xf32>
    %28 = tpu.matmul %26, %27, %cst_12 {dimension_numbers = #tpu.dot_dimension_numbers<[1], [0], [0], [1], [0, 0, 1, 1], [], []>} : vector<8x32xbf16>, vector<32x96xbf16>, vector<8x96xf32> -> vector<8x96xf32>
    %c0_13 = arith.constant 0 : index
    %c0_14 = arith.constant 0 : index
    %29 = vector.load %arg5[%c0_13, %c0_14] : memref<1x96xf32, #tpu.memory_space<vmem>>, vector<1x96xf32>
    %30 = vector.broadcast %29 : vector<1x96xf32> to vector<8x96xf32>
    %31 = arith.addf %28, %30 : vector<8x96xf32>
    %32 = vector.extract_strided_slice %31 {offsets = [0, 0], sizes = [8, 32], strides = [1, 1]} : vector<8x96xf32> to vector<8x32xf32>
    %33 = vector.extract_strided_slice %31 {offsets = [0, 32], sizes = [8, 32], strides = [1, 1]} : vector<8x96xf32> to vector<8x32xf32>
    %34 = vector.extract_strided_slice %31 {offsets = [0, 64], sizes = [8, 32], strides = [1, 1]} : vector<8x96xf32> to vector<8x32xf32>
    %35 = vector.shape_cast %32 : vector<8x32xf32> to vector<1x8x4x8xf32>
    %36 = tpu.transpose %35, [0, 2, 1, 3] : vector<1x8x4x8xf32> -> vector<1x4x8x8xf32>
    %37 = vector.shape_cast %36 : vector<1x4x8x8xf32> to vector<4x8x8xf32>
    %38 = arith.truncf %37 : vector<4x8x8xf32> to vector<4x8x8xbf16>
    %39 = vector.shape_cast %33 : vector<8x32xf32> to vector<1x8x4x8xf32>
    %40 = tpu.transpose %39, [0, 2, 1, 3] : vector<1x8x4x8xf32> -> vector<1x4x8x8xf32>
    %41 = vector.shape_cast %40 : vector<1x4x8x8xf32> to vector<4x8x8xf32>
    %42 = arith.truncf %41 : vector<4x8x8xf32> to vector<4x8x8xbf16>
    %43 = vector.shape_cast %34 : vector<8x32xf32> to vector<1x8x4x8xf32>
    %44 = tpu.transpose %43, [0, 2, 1, 3] : vector<1x8x4x8xf32> -> vector<1x4x8x8xf32>
    %45 = vector.shape_cast %44 : vector<1x4x8x8xf32> to vector<4x8x8xf32>
    %46 = arith.truncf %45 : vector<4x8x8xf32> to vector<4x8x8xbf16>
    "tpu.trace_start"() <{level = 10 : i32, message = "hqd,hkd->hqk"}> : () -> ()
    %cst_15 = arith.constant dense<0.000000e+00> : vector<4x8x8xf32>
    %47 = tpu.matmul %38, %42, %cst_15 {dimension_numbers = #tpu.dot_dimension_numbers<[2], [2], [1], [1], [0, 0, 0, 1, 1, 1], [0], [0]>} : vector<4x8x8xbf16>, vector<4x8x8xbf16>, vector<4x8x8xf32> -> vector<4x8x8xf32>
    "tpu.trace_stop"() : () -> ()
    %cst_16 = arith.constant dense<0xFF800000> : vector<4x8xf32>
    %48 = vector.multi_reduction <maximumf>, %47, %cst_16 [2] : vector<4x8x8xf32> to vector<4x8xf32>
    %49 = vector.shape_cast %48 : vector<4x8xf32> to vector<4x8x1xf32>
    %50 = vector.broadcast %49 : vector<4x8x1xf32> to vector<4x8x8xf32>
    %51 = arith.subf %47, %50 : vector<4x8x8xf32>
    %52 = math.exp %51 : vector<4x8x8xf32>
    %cst_17 = arith.constant dense<0.000000e+00> : vector<4x8xf32>
    %53 = vector.multi_reduction <add>, %52, %cst_17 [2] : vector<4x8x8xf32> to vector<4x8xf32>
    %54 = vector.shape_cast %53 : vector<4x8xf32> to vector<4x8x1xf32>
    %55 = tpu.reciprocal %54 {approx = true} : vector<4x8x1xf32> -> vector<4x8x1xf32>
    %56 = vector.broadcast %55 : vector<4x8x1xf32> to vector<4x8x8xf32>
    %57 = arith.mulf %52, %56 : vector<4x8x8xf32>
    %58 = vector.shape_cast %57 : vector<4x8x8xf32> to vector<1x4x8x8xf32>
    %59 = arith.truncf %58 : vector<1x4x8x8xf32> to vector<1x4x8x8xbf16>
    %c0_18 = arith.constant 0 : index
    %c0_19 = arith.constant 0 : index
    %c0_20 = arith.constant 0 : index
    %c0_21 = arith.constant 0 : index
    %60 = vector.load %arg15[%c0_18, %c0_19, %c0_20, %c0_21] : memref<1x4x8x8xbf16, #tpu.memory_space<vmem>>, vector<1x4x8x8xbf16>
    tpu.vector_store %arg15[%c0_18, %c0_19, %c0_20, %c0_21], %59 {strides = array<i32>} : memref<1x4x8x8xbf16, #tpu.memory_space<vmem>>, vector<1x4x8x8xbf16>,
    %61 = arith.truncf %57 : vector<4x8x8xf32> to vector<4x8x8xbf16>
    "tpu.trace_start"() <{level = 10 : i32, message = "hqk,hkd->hqd"}> : () -> ()
    %cst_22 = arith.constant dense<0.000000e+00> : vector<4x8x8xf32>
    %62 = tpu.matmul %61, %46, %cst_22 {dimension_numbers = #tpu.dot_dimension_numbers<[2], [1], [1], [2], [0, 0, 0, 1, 1, 2], [0], [0]>} : vector<4x8x8xbf16>, vector<4x8x8xbf16>, vector<4x8x8xf32> -> vector<4x8x8xf32>
    "tpu.trace_stop"() : () -> ()
    %63 = vector.shape_cast %62 : vector<4x8x8xf32> to vector<1x4x8x8xf32>
    %64 = tpu.transpose %63, [0, 2, 1, 3] : vector<1x4x8x8xf32> -> vector<1x8x4x8xf32>
    %65 = vector.shape_cast %64 : vector<1x8x4x8xf32> to vector<8x32xf32>
    %66 = arith.truncf %65 : vector<8x32xf32> to vector<8x32xbf16>
    %c0_23 = arith.constant 0 : index
    %c0_24 = arith.constant 0 : index
    %67 = vector.load %arg6[%c0_23, %c0_24] : memref<32x32xbf16, #tpu.memory_space<vmem>>, vector<32x32xbf16>
    %cst_25 = arith.constant dense<0.000000e+00> : vector<8x32xf32>
    %68 = tpu.matmul %66, %67, %cst_25 {dimension_numbers = #tpu.dot_dimension_numbers<[1], [0], [0], [1], [0, 0, 1, 1], [], []>} : vector<8x32xbf16>, vector<32x32xbf16>, vector<8x32xf32> -> vector<8x32xf32>
    %c0_26 = arith.constant 0 : index
    %c0_27 = arith.constant 0 : index
    %69 = vector.load %arg7[%c0_26, %c0_27] : memref<1x32xf32, #tpu.memory_space<vmem>>, vector<1x32xf32>
    %70 = vector.broadcast %69 : vector<1x32xf32> to vector<8x32xf32>
    %71 = arith.addf %68, %70 : vector<8x32xf32>
    %72 = arith.addf %71, %1 : vector<8x32xf32>
    %c0_28 = arith.constant 0 : index
    %c0_29 = arith.constant 0 : index
    %73 = vector.load %arg8[%c0_28, %c0_29] : memref<1x32xf32, #tpu.memory_space<vmem>>, vector<1x32xf32>
    %c0_30 = arith.constant 0 : index
    %c0_31 = arith.constant 0 : index
    %74 = vector.load %arg9[%c0_30, %c0_31] : memref<1x32xf32, #tpu.memory_space<vmem>>, vector<1x32xf32>
    %cst_32 = arith.constant dense<0.000000e+00> : vector<8xf32>
    %75 = vector.multi_reduction <add>, %72, %cst_32 [1] : vector<8x32xf32> to vector<8xf32>
    %76 = vector.shape_cast %75 : vector<8xf32> to vector<8x1xf32>
    %cst_33 = arith.constant 3.200000e+01 : f32
    %77 = vector.broadcast %cst_33 : f32 to vector<8x1xf32>
    %78 = arith.divf %76, %77 : vector<8x1xf32>
    %79 = vector.broadcast %78 : vector<8x1xf32> to vector<8x32xf32>
    %80 = arith.subf %72, %79 : vector<8x32xf32>
    %81 = arith.mulf %80, %80 : vector<8x32xf32>
    %cst_34 = arith.constant dense<0.000000e+00> : vector<8xf32>
    %82 = vector.multi_reduction <add>, %81, %cst_34 [1] : vector<8x32xf32> to vector<8xf32>
    %83 = vector.shape_cast %82 : vector<8xf32> to vector<8x1xf32>
    %cst_35 = arith.constant 3.200000e+01 : f32
    %84 = vector.broadcast %cst_35 : f32 to vector<8x1xf32>
    %85 = arith.divf %83, %84 : vector<8x1xf32>
    %86 = vector.broadcast %78 : vector<8x1xf32> to vector<8x32xf32>
    %87 = arith.subf %72, %86 : vector<8x32xf32>
    %cst_36 = arith.constant 9.99999974E-6 : f32
    %88 = vector.broadcast %cst_36 : f32 to vector<8x1xf32>
    %89 = arith.addf %85, %88 : vector<8x1xf32>
    %90 = math.rsqrt %89 : vector<8x1xf32>
    %91 = vector.broadcast %90 : vector<8x1xf32> to vector<8x32xf32>
    %92 = arith.mulf %87, %91 : vector<8x32xf32>
    %93 = vector.broadcast %73 : vector<1x32xf32> to vector<8x32xf32>
    %94 = arith.mulf %92, %93 : vector<8x32xf32>
    %95 = vector.broadcast %74 : vector<1x32xf32> to vector<8x32xf32>
    %96 = arith.addf %94, %95 : vector<8x32xf32>
    %97 = arith.truncf %96 : vector<8x32xf32> to vector<8x32xbf16>
    %c0_37 = arith.constant 0 : index
    %c0_38 = arith.constant 0 : index
    %98 = vector.load %arg10[%c0_37, %c0_38] : memref<32x64xbf16, #tpu.memory_space<vmem>>, vector<32x64xbf16>
    %cst_39 = arith.constant dense<0.000000e+00> : vector<8x64xf32>
    %99 = tpu.matmul %97, %98, %cst_39 {dimension_numbers = #tpu.dot_dimension_numbers<[1], [0], [0], [1], [0, 0, 1, 1], [], []>} : vector<8x32xbf16>, vector<32x64xbf16>, vector<8x64xf32> -> vector<8x64xf32>
    %c0_40 = arith.constant 0 : index
    %c0_41 = arith.constant 0 : index
    %100 = vector.load %arg11[%c0_40, %c0_41] : memref<1x64xf32, #tpu.memory_space<vmem>>, vector<1x64xf32>
    %101 = vector.broadcast %100 : vector<1x64xf32> to vector<8x64xf32>
    %102 = arith.addf %99, %101 : vector<8x64xf32>
    %cst_42 = arith.constant 0.000000e+00 : f32
    %103 = vector.broadcast %cst_42 : f32 to vector<8x64xf32>
    %104 = arith.maximumf %102, %103 : vector<8x64xf32>
    %105 = arith.truncf %104 : vector<8x64xf32> to vector<8x64xbf16>
    %c0_43 = arith.constant 0 : index
    %c0_44 = arith.constant 0 : index
    %106 = vector.load %arg12[%c0_43, %c0_44] : memref<64x32xbf16, #tpu.memory_space<vmem>>, vector<64x32xbf16>
    %cst_45 = arith.constant dense<0.000000e+00> : vector<8x32xf32>
    %107 = tpu.matmul %105, %106, %cst_45 {dimension_numbers = #tpu.dot_dimension_numbers<[1], [0], [0], [1], [0, 0, 1, 1], [], []>} : vector<8x64xbf16>, vector<64x32xbf16>, vector<8x32xf32> -> vector<8x32xf32>
    %c0_46 = arith.constant 0 : index
    %c0_47 = arith.constant 0 : index
    %108 = vector.load %arg13[%c0_46, %c0_47] : memref<1x32xf32, #tpu.memory_space<vmem>>, vector<1x32xf32>
    %109 = vector.broadcast %108 : vector<1x32xf32> to vector<8x32xf32>
    %110 = arith.addf %107, %109 : vector<8x32xf32>
    %111 = arith.addf %110, %72 : vector<8x32xf32>
    %112 = vector.shape_cast %111 : vector<8x32xf32> to vector<1x8x32xf32>
    %c0_48 = arith.constant 0 : index
    %c0_49 = arith.constant 0 : index
    %c0_50 = arith.constant 0 : index
    %113 = vector.load %arg14[%c0_48, %c0_49, %c0_50] : memref<1x8x32xf32, #tpu.memory_space<vmem>>, vector<1x8x32xf32>
    tpu.vector_store %arg14[%c0_48, %c0_49, %c0_50], %112 {strides = array<i32>} : memref<1x8x32xf32, #tpu.memory_space<vmem>>, vector<1x8x32xf32>,
    return
  }
  func.func @transform_0(%arg0: i32) -> (i32, i32, i32) {
    %c0_i32 = arith.constant 0 : i32
    %c0_i32_0 = arith.constant 0 : i32
    %c0_i32_1 = arith.constant 0 : i32
    return %arg0, %c0_i32, %c0_i32_0 : i32, i32, i32
  }
  func.func @transform_1(%arg0: i32) -> (i32, i32) {
    %c0_i32 = arith.constant 0 : i32
    %c0_i32_0 = arith.constant 0 : i32
    %c0_i32_1 = arith.constant 0 : i32
    return %c0_i32, %c0_i32_0 : i32, i32
  }
  func.func @transform_2(%arg0: i32) -> (i32, i32) {
    %c0_i32 = arith.constant 0 : i32
    %c0_i32_0 = arith.constant 0 : i32
    %c0_i32_1 = arith.constant 0 : i32
    return %c0_i32, %c0_i32_0 : i32, i32
  }
  func.func @transform_3(%arg0: i32) -> (i32, i32) {
    %c0_i32 = arith.constant 0 : i32
    %c0_i32_0 = arith.constant 0 : i32
    %c0_i32_1 = arith.constant 0 : i32
    return %c0_i32, %c0_i32_0 : i32, i32
  }
  func.func @transform_4(%arg0: i32) -> (i32, i32) {
    %c0_i32 = arith.constant 0 : i32
    %c0_i32_0 = arith.constant 0 : i32
    %c0_i32_1 = arith.constant 0 : i32
    return %c0_i32, %c0_i32_0 : i32, i32
  }
  func.func @transform_5(%arg0: i32) -> (i32, i32) {
    %c0_i32 = arith.constant 0 : i32
    %c0_i32_0 = arith.constant 0 : i32
    %c0_i32_1 = arith.constant 0 : i32
    return %c0_i32, %c0_i32_0 : i32, i32
  }
  func.func @transform_6(%arg0: i32) -> (i32, i32) {
    %c0_i32 = arith.constant 0 : i32
    %c0_i32_0 = arith.constant 0 : i32
    %c0_i32_1 = arith.constant 0 : i32
    return %c0_i32, %c0_i32_0 : i32, i32
  }
  func.func @transform_7(%arg0: i32) -> (i32, i32) {
    %c0_i32 = arith.constant 0 : i32
    %c0_i32_0 = arith.constant 0 : i32
    %c0_i32_1 = arith.constant 0 : i32
    return %c0_i32, %c0_i32_0 : i32, i32
  }
  func.func @transform_8(%arg0: i32) -> (i32, i32) {
    %c0_i32 = arith.constant 0 : i32
    %c0_i32_0 = arith.constant 0 : i32
    %c0_i32_1 = arith.constant 0 : i32
    return %c0_i32, %c0_i32_0 : i32, i32
  }
  func.func @transform_9(%arg0: i32) -> (i32, i32) {
    %c0_i32 = arith.constant 0 : i32
    %c0_i32_0 = arith.constant 0 : i32
    %c0_i32_1 = arith.constant 0 : i32
    return %c0_i32, %c0_i32_0 : i32, i32
  }
  func.func @transform_10(%arg0: i32) -> (i32, i32) {
    %c0_i32 = arith.constant 0 : i32
    %c0_i32_0 = arith.constant 0 : i32
    %c0_i32_1 = arith.constant 0 : i32
    return %c0_i32, %c0_i32_0 : i32, i32
  }
  func.func @transform_11(%arg0: i32) -> (i32, i32) {
    %c0_i32 = arith.constant 0 : i32
    %c0_i32_0 = arith.constant 0 : i32
    %c0_i32_1 = arith.constant 0 : i32
    return %c0_i32, %c0_i32_0 : i32, i32
  }
  func.func @transform_12(%arg0: i32) -> (i32, i32) {
    %c0_i32 = arith.constant 0 : i32
    %c0_i32_0 = arith.constant 0 : i32
    %c0_i32_1 = arith.constant 0 : i32
    return %c0_i32, %c0_i32_0 : i32, i32
  }
  func.func @transform_13(%arg0: i32) -> (i32, i32, i32) {
    %c0_i32 = arith.constant 0 : i32
    %c0_i32_0 = arith.constant 0 : i32
    %c0_i32_1 = arith.constant 0 : i32
    return %arg0, %c0_i32, %c0_i32_0 : i32, i32, i32
  }
  func.func @transform_14(%arg0: i32) -> (i32, i32, i32, i32) {
    %c0_i32 = arith.constant 0 : i32
    %c0_i32_0 = arith.constant 0 : i32
    %c0_i32_1 = arith.constant 0 : i32
    %c0_i32_2 = arith.constant 0 : i32
    return %arg0, %c0_i32, %c0_i32_0, %c0_i32_1 : i32, i32, i32, i32
  }
}

</mosaic_0001>

<bundles_post_ra>
// kernel: tpu_custom_call.1
= control target key start
LH: loop header
LB: loop body
LE: loop exit
PB: predicated region body
PF: predicated region fallthrough
CT: control target
= control target key end

     0   :  { %s3191_s0 = inlined_call_operand.vmem [shape: f32[2,8,32], index: 0, kind: input, shape index: {}]   ;;  %s3192_s1 = inlined_call_operand.vmem [shape: f32[1,32], index: 1, kind: input, shape index: {}]   ;;  %s3193_s2 = inlined_call_operand.vmem [shape: f32[1,32], index: 2, kind: input, shape index: {}]   ;;  %s3194_s3 = inlined_call_operand.vmem [shape: bf16[32,96], index: 3, kind: input, shape index: {}]   ;;  %s3195_s4 = inlined_call_operand.hbm [shape: f32[1,96], index: 4, kind: input, shape index: {}]   ;;  %s3196_s5 = inlined_call_operand.vmem [shape: bf16[32,32], index: 5, kind: input, shape index: {}]   ;;  %s3197_s6 = inlined_call_operand.hbm [shape: f32[1,32], index: 6, kind: input, shape index: {}]   ;;  %s3198_s7 = inlined_call_operand.hbm [shape: f32[1,32], index: 7, kind: input, shape index: {}]   ;;  %s3199_s8 = inlined_call_operand.hbm [shape: f32[1,32], index: 8, kind: input, shape index: {}]   ;;  %s3200_s9 = inlined_call_operand.vmem [shape: bf16[32,64], index: 9, kind: input, shape index: {}]   ;;  %s3201_s10 = inlined_call_operand.vmem [shape: f32[1,64], index: 10, kind: input, shape index: {}]   ;;  %s3202_s11 = inlined_call_operand.vmem [shape: bf16[64,32], index: 11, kind: input, shape index: {}]   ;;  %s3203_s12 = inlined_call_operand.vmem [shape: f32[1,32], index: 12, kind: input, shape index: {}]   ;;  %s3204_s13 = inlined_call_operand.hbm [shape: f32[2,8,32], index: 13, kind: output, shape index: {0}]   ;;  %s3205_s14 = inlined_call_operand.hbm [shape: bf16[2,4,8,8], index: 14, kind: output, shape index: {1}]  }
   0x1   :  { %3216 = sst [smem:[#allocation24_spill]] %s3191_s0 }
   0x2   :  { %3217 = sst [smem:[#allocation25_spill]] %s3203_s12 }
   0x3   :  { %3218 = sst [smem:[#allocation26_spill]] %s3204_s13 }
   0x4   :  { %20 = vsyncpa [#allocation3], 0 }
   0x5   :  { %21 = vsyncpa [#allocation6], 0 }
   0x6   :  { %22 = vsyncpa [#allocation9], 0 }
   0x7   :  { %23 = vsyncpa [#allocation4], 0 }
   0x8   :  { %25 = vsyncpa [#allocation4 + $0x1], 0 }
   0x9   :  { %26 = vsyncpa [#allocation12], 0 }
   0xa   :  { %28 = vsyncpa [#allocation12 + $0x1], 0  ;;  %s2690_s29 = smov 0   ;;  %s2692_s30 = smov 0  }
   0xb   :  { %s2694_s15 = smov 0   ;;  %s2696_s16 = smov 0  }
   0xc LB: > { %3219 = sst [smem:[#allocation18_spill]] %s2582_s29  ;;  %s2711_s17 = sadd.s32 4294967295, %s2594_s16   ;;  %s2594_s16 = sphi %s2696_s16, %s3245_s16   ;;  %s2590_s15 = sphi %s2694_s15, %s3247_s15   ;;  %s2586_s30 = sphi %s2692_s30, %s3249_s30   ;;  %s2582_s29 = sphi %s2690_s29, %s3248_s29  }
   0xd   : > { %3220 = sst [smem:[#allocation19_spill]] %s2590_s15  ;;  %s2073_s18 = sadd.s32 4294967294, %s2594_s16  }
   0xe   : > { %3221 = sst [smem:[#allocation20_spill]] %s2594_s16  ;;  %s2715_s19 = sadd.s32 1, %s2594_s16  }
   0xf   : > { %3222 = sst [smem:[#allocation21_spill]] %s2715_s19  ;;  %s319_s20 = sadd.s32 1, %s2590_s15 }
  0x10   : > { %s316_s21 = ssub.s32 %s2594_s16, %s2715_s19  ;;  %p329_p0 = scmp.ne.s32.totalorder %s2590_s15, %s2586_s30 }
  0x11   : > { %p317_p1 = scmp.eq.s32.totalorder %s316_s21, 0  ;;  %p330_p2 = scmp.eq.s32.totalorder %s2711_s17, 1 }
  0x12   : > { %p335_p3 = scmp.ne.s32.totalorder %s2586_s30, %s2582_s29  ;;  %p336_p4 = scmp.eq.s32.totalorder %s2073_s18, 1 }
  0x13   : > { %s2726_s22 = scalar_select %p317_p1, %s2590_s15, %s319_s20  }
  0x14   : > { %p2728_p5 = por %p330_p2, %p329_p0  ;;  %p2732_p6 = por %p336_p4, %p335_p3 }
  0x15   : > { %3223 = sst [smem:[#allocation22_spill]] %s2726_s22  ;;  %p2074_p7 = scmp.ge.s32.totalorder %s2594_s16, 1 }
  0x16   : > { %s3224_s23 = scalar_select %p2728_p5, 1, 0 }
  0x17   : > { %s3225_s24 = scalar_select %p2732_p6, 1, 0 }
  0x18   : > { %p369_p8 = scmp.lt.s32.totalorder %s2594_s16, 3  ;;  %p3212_p9 = scmp.eq.s32.totalorder %s2711_s17, 0 }
  0x19   : > { %3226 = sst [smem:[#allocation23_spill]] %s3225_s24  ;;  %s2596_s26 = smov [#allocation5]  }
  0x1a   : > { %p2739_p10 = pnand %p2074_p7, %p369_p8  ;;  %s405_s27 = sshll.u32 %s2596_s26, 4  ;;  %s406_s27 = int_to_ptr.vmem [resolvable:$true] %s405_s27 }
  0x1b   : > { %s2597_s28 = smov [#allocation2]   ;;  %s2598_s21 = smov [#allocation7]  }
  0x1c   : > { %s3227_s25 = scalar_select %p2739_p10, 1, 0 }
  0x1d   : > { %p2268_p11 = pneg %p2739_p10  ;;  %s391_s18 = sshll.u32 %s2597_s28, 4  ;;  %s2751_s18 = int_to_ptr.vmem [resolvable:$true] %s391_s18 }
  0x1e   : > { %s416_s22 = sshll.u32 %s2598_s21, 4  ;;  %s2376_s26 = scalar_lea.hbm %s3197_s6, 16  ;;  %s2753_s22 = int_to_ptr.vmem [resolvable:$true] %s416_s22 }
  0x1f   : > { %p2747_p12 = pnand %p3212_p9, %p2268_p11  ;;  %p2377_p13 = scmp.ne.s32.totalorder %s3197_s6, %s2376_s26 }
  0x20   : > { %p2383_p3 = scmp.lt.u32.totalorder %s2376_s26, %s3197_s6 }
  0x21   : > { %p2763_p0 = pneg %p2747_p12 }
  0x23   : > { %p2379_p1 = pnand %p2763_p0, %p2377_p13 }
  0x25   : > { %p2380_p2 = pneg %p2379_p1 }
  0x27   : > { %p2385_p4 = pnand %p2383_p3, %p2380_p2 }
  0x29   : > { %2388 = shalt.err (!%p2385_p4)
}
  0x2a   : > { %s2389_s15 = scalar_lea.vmem %s406_s27, 16  ;;  %s2396_s29 = scalar_lea.vmem %s406_s27, 32 }
  0x2b   : > { %p2390_p7 = scmp.ne.s32.totalorder %s406_s27, %s2389_s15  ;;  %p2397_p9 = scmp.lt.s32.totalorder %s406_s27, %s406_s27 }
  0x2c   : > { %p2398_p6 = scmp.lt.s32.totalorder %s2396_s29, %s2389_s15 }
  0x2d   : > { %p2392_p8 = pnand %p2390_p7, %p2763_p0 }
  0x2e   : > { %p2399_p5 = por %p2398_p6, %p2397_p9 }
  0x2f   : > { %p2393_p11 = pneg %p2392_p8 }
  0x31   : > { %p2400_p10 = pnand %p2399_p5, %p2393_p11 }
  0x33   : > { %2403 = shalt.err (!%p2400_p10)
}
  0x34   : > { %2274 = dma.hbm_to_vmem [thread:$0]  (!%p2747_p12), %s3197_s6, 16, %s406_s27, [#allocation6]  }
  0x35   : > { %s2404_s21 = scalar_lea.hbm %s3195_s4, 16 }
  0x36   : > { %p2405_p13 = scmp.ne.s32.totalorder %s3195_s4, %s2404_s21  ;;  %p2411_p5 = scmp.lt.u32.totalorder %s2404_s21, %s3195_s4 }
  0x38   : > { %p2407_p1 = pnand %p2405_p13, %p2763_p0 }
  0x3a   : > { %p2408_p6 = pneg %p2407_p1 }
  0x3c   : > { %p2413_p9 = pnand %p2411_p5, %p2408_p6 }
  0x3e   : > { %2416 = shalt.err (!%p2413_p9)
}
  0x3f   : > { %s2417_s27 = scalar_lea.vmem %s2751_s18, 16  ;;  %s2424_s12 = scalar_lea.vmem %s2751_s18, 32 }
  0x40   : > { %p2418_p10 = scmp.ne.s32.totalorder %s2751_s18, %s2417_s27  ;;  %p2425_p4 = scmp.lt.s32.totalorder %s2751_s18, %s2751_s18 }
  0x41   : > { %p2426_p7 = scmp.lt.s32.totalorder %s2424_s12, %s2417_s27 }
  0x42   : > { %p2420_p2 = pnand %p2418_p10, %p2763_p0 }
  0x43   : > { %p2427_p8 = por %p2426_p7, %p2425_p4 }
  0x44   : > { %p2421_p3 = pneg %p2420_p2 }
  0x46   : > { %p2428_p11 = pnand %p2427_p8, %p2421_p3 }
  0x48   : > { %2431 = shalt.err (!%p2428_p11)
}
  0x49   : > { %2271 = dma.hbm_to_vmem [thread:$0]  (!%p2747_p12), %s3195_s4, 16, %s2751_s18, [#allocation3]  }
  0x4a   : > { %s2432_s26 = scalar_lea.hbm %s3198_s7, 16 }
  0x4b   : > { %p2433_p13 = scmp.ne.s32.totalorder %s3198_s7, %s2432_s26  ;;  %p2439_p5 = scmp.lt.u32.totalorder %s2432_s26, %s3198_s7 }
  0x4d   : > { %p2435_p1 = pnand %p2433_p13, %p2763_p0 }
  0x4f   : > { %p2436_p6 = pneg %p2435_p1 }
  0x51   : > { %p2441_p9 = pnand %p2439_p5, %p2436_p6 }
  0x53   : > { %2444 = shalt.err (!%p2441_p9)
}
  0x54   : > { %s2445_s18 = scalar_lea.vmem %s2753_s22, 16  ;;  %s2452_s12 = scalar_lea.vmem %s2753_s22, 32 }
  0x55   : > { %p2446_p10 = scmp.ne.s32.totalorder %s2753_s22, %s2445_s18  ;;  %p2453_p4 = scmp.lt.s32.totalorder %s2753_s22, %s2753_s22 }
  0x56   : > { %p2454_p7 = scmp.lt.s32.totalorder %s2452_s12, %s2445_s18 }
  0x57   : > { %p2448_p2 = pnand %p2446_p10, %p2763_p0 }
  0x58   : > { %p2455_p8 = por %p2454_p7, %p2453_p4 }
  0x59   : > { %p2449_p3 = pneg %p2448_p2 }
  0x5b   : > { %p2456_p11 = pnand %p2455_p8, %p2449_p3 }
  0x5d   : > { %2459 = shalt.err (!%p2456_p11)
}
  0x5e   : > { %2277 = dma.hbm_to_vmem [thread:$0]  (!%p2747_p12), %s3198_s7, 16, %s2753_s22, [#allocation6]  }
  0x5f   : > { %s2599_s24 = smov [#allocation8]   ;;  %s2460_s15 = scalar_lea.hbm %s3199_s8, 16 }
  0x60   : > { %s427_s16 = sshll.u32 %s2599_s24, 4  ;;  %p2461_p13 = scmp.ne.s32.totalorder %s3199_s8, %s2460_s15  ;;  %s428_s16 = int_to_ptr.vmem [resolvable:$true] %s427_s16 }
  0x61   : > { %p2467_p5 = scmp.lt.u32.totalorder %s2460_s15, %s3199_s8 }
  0x62   : > { %p2463_p1 = pnand %p2461_p13, %p2763_p0 }
  0x64   : > { %p2464_p6 = pneg %p2463_p1 }
  0x66   : > { %p2469_p9 = pnand %p2467_p5, %p2464_p6 }
  0x68   : > { %2472 = shalt.err (!%p2469_p9)
}
  0x69   : > { %s2473_s22 = scalar_lea.vmem %s428_s16, 16  ;;  %s2480_s13 = scalar_lea.vmem %s428_s16, 32 }
  0x6a   : > { %p2474_p10 = scmp.ne.s32.totalorder %s428_s16, %s2473_s22  ;;  %p2481_p4 = scmp.lt.s32.totalorder %s428_s16, %s428_s16 }
  0x6b   : > { %p2482_p7 = scmp.lt.s32.totalorder %s2480_s13, %s2473_s22 }
  0x6c   : > { %p2476_p2 = pnand %p2474_p10, %p2763_p0 }
  0x6d   : > { %p2483_p8 = por %p2482_p7, %p2481_p4 }
  0x6e   : > { %p2477_p3 = pneg %p2476_p2 }
  0x70   : > { %p2484_p11 = pnand %p2483_p8, %p2477_p3 }
  0x72   : > { %2487 = shalt.err (!%p2484_p11)
}
  0x73   : > { %2280 = dma.hbm_to_vmem [thread:$0]  (!%p2747_p12), %s3199_s8, 16, %s428_s16, [#allocation9]  }
  0x74   : > { %p3230_p13 = scmp.ne.s32.totalorder %s3227_s25, 0 }
  0x75   : > { %p3231_p1 = scmp.eq.s32.totalorder (!%p3230_p13), %s2711_s17, 0 }
  0x76   : > { %459 = sbr.rel (%p3230_p13) target bundleno = 2852 (0xb24), region = 72 }
  0x7d   : > { %2561 = dma.done.wait (%p3231_p1), [#allocation3], 16   ;;  %p3232_p0 = pmov %p3231_p1 }
  0x7f   : > { %2563 = vsyncadd (%p3232_p0), [#allocation3], 4294967280  ;;  %p3233_p6 = pmov %p3232_p0 }
  0x80   : > { %p3234_p5 = pmov %p3232_p0 }
  0x81   : > { %2565 = dma.done.wait (%p3233_p6), [#allocation6], 32  }
  0x82   : > { %2567 = vsyncadd (%p3234_p5), [#allocation6], 4294967264  ;;  %p3235_p9 = pmov %p3232_p0 }
  0x83   : > { %p3236_p12 = pmov %p3232_p0 }
  0x84   : > { %2569 = dma.done.wait (%p3235_p9), [#allocation9], 16  }
  0x85   : > { %2571 = vsyncadd (%p3236_p12), [#allocation9], 4294967280  ;;  %p521_p10 = scmp.lt.s32.totalorder %s2711_s17, 1  ;;  %s3237_s0 = sld [smem:[#allocation24_spill]]  ;;  %vm529_vm0 = vcmask 261120   ;;  %v2346_v7 = vld [vmem:[%s3194_s3] sm:$0xff]   ;;  %v640_v31 = vlaneseq }
  0x86   : > { %v2600_v8 = vmov 0.0   ;;  %vm2601_vm1 = vmmov 0   ;;  %v2347_v9 = vld [vmem:[%s3194_s3 + $0x8] sm:$0xff]   ;;  %v2088_v14 = vld [vmem:[%s3192_s1] ss:$0 sm:$0xff]  ;;  %s2602_s19 = smov 104  }
  0x87   : > { %s522_s25 = scalar_select %p521_p10, %s2711_s17, 1  ;;  %2164 = vmatprep.subr.bf16.mxu0 %v2600_v8  ;;  %2168 = vmatprep.mubr.msk.bf16.mxu0 %vm2601_vm1, %v2600_v8  ;;  %v2089_v16 = vld [vmem:[%s3193_s2] ss:$0 sm:$0xff]  ;;  %v2606_v29 = vmov 1983009808   ;;  %v641_v33 = vshrl.u32 %v640_v31, 7 }
  0x88   : > { %2165 = vmatpush3.bf16.msra.mxu0 %v2346_v7  ;;  %2172 = vmatprep.subr.bf16.mxu1 %v2600_v8  ;;  %v2090_v20 = vld [vmem:[#allocation2] ss:$0 sm:$0xff]  ;;  %s2603_s24 = smov 120   ;;  %v638_v30 = vunpack.c.l.s4 %v2606_v29  ;;  %v2607_v35 = vmov 1934713408   ;;  %vm1079_vm2 = vcmask 64512  }
  0x89   : > { %s2087_s20 = sshll.u32 %s522_s25, 3  ;;  %2166 = vmatprep.subr.bf16.mxu0 %v2600_v8  ;;  %2174 = vmatprep.mubr.msk.bf16.mxu1 %vm2601_vm1, %v2600_v8  ;;  %s2604_s25 = smov 112   ;;  %v670_v36 = vunpack.c.l.s4 %v2607_v35  ;;  %vm1312_vm3 = vcmask 60416   ;;  %vm1320_vm4 = vcmask 1043456   ;;  %vm1651_vm5 = vcmask 130048  }
  0x8a   : > { %v639_v32 = vunpack.c.0.s8 %v638_v30  ;;  %s2608_s28 = smov 64   ;;  %s2995_s16 = sand.u32 1, %s2586_s30   ;;  %vm1653_vm6 = vcmask 195584   ;;  %vm1860_vm7 = vcmask 523264  }
  0x8b   : > { %s524_s26 = scalar_lea.vmem %s3237_s0, %s2087_s20  ;;  %s2605_s20 = smov 96   ;;  %v671_v43 = vunpack.c.0.s8 %v670_v36 }
  0x8c   : > { %v2864_v0 = vld [vmem:[%s524_s26] sm:$0xff]  ;;  %2167 = vmatpush3.bf16.msra.mxu0 %v2347_v9  ;;  %v2912_v39 = vsub.s32 %v639_v32, %v641_v33  ;;  %s2086_s26 = sshll.u32 %s2995_s16, 4  ;;  %s2609_s12 = smov 16  }
  0x8d   : > { %v530_v1 = vsel %vm529_vm0, %v2864_v0, 0.0  ;;  %2178 = vmatprep.subr.bf16.mxu0 %v2600_v8  ;;  %v2922_v49 = vsub.s32 %v671_v43, %v641_v33  ;;  %s3006_s21 = scalar_lea.vmem [#allocation11], %s2086_s26  ;;  %s2610_s22 = smov 8  }
  0x8e   : > { %531 = vadd.xlane.f32.xlu0 %v530_v1  ;;  %s2611_s13 = smov 24   ;;  %s1912_s27 = scalar_lea.sflag [#allocation12], %s2995_s16 }
  0x8f   : > { %p3238_p3 = scmp.ne.s32.totalorder %s3224_s23, 0 }
 0x11b   : > { %v532_v2 = vpop.xlane.xlu0 %531 }
 0x11c   : > { %v534_v3 = vmul.f32 0.03125, %v532_v2 }
 0x11e   : > { %v535_v4 = vsub.f32 %v2864_v0, %v534_v3 }
 0x120   : > { %v536_v5 = vmul.f32 %v535_v4, %v535_v4 }
 0x122   : > { %v537_v6 = vsel %vm529_vm0, %v536_v5, 0.0 }
 0x123   : > { %538 = vadd.xlane.f32.xlu0 %v537_v6 }
 0x1b0   : > { %v539_v10 = vpop.xlane.xlu0 %538 }
 0x1b1   : > { %v540_v11 = vmul.f32 0.03125, %v539_v10 }
 0x1b3   : > { %v541_v12 = vadd.f32 1e-05, %v540_v11 }
 0x1b5   : > { %2356 = vrsqrt.f32 %v541_v12 }
 0x1bf   : > { %v2357_v13 = vpop.eup %2356 }
 0x1c0   : > { %v543_v15 = vmul.f32 %v2357_v13, %v535_v4 }
 0x1c2   : > { %v550_v17 = vmul.f32 %v2088_v14, %v543_v15 }
 0x1c4   : > { %v557_v18 = vadd.f32 %v2089_v16, %v550_v17 }
 0x1c6   : > { %v558_v19 = vpack.c.bf16 %v557_v18, %v557_v18 }
 0x1c8   : > { %2169 = vmatmul.mubr.msk.bf16.vlgmr.msra.gmra.mrb[0].mxu0 %vm529_vm0, %v558_v19 }
 0x1c9   : > { %2180 = vmatprep.mubr.msk.bf16.mxu0 %vm2601_vm1, %v2600_v8 }
 0x29b   : > { %v619_v21 = vpop.f32.mrb[0].mxu0 }
 0x29c   : > { %v2893_v22 = vadd.f32 %v2090_v20, %v619_v21  ;;  %v2170_v23 = vpop.f32.mrb[1].mxu0 }
 0x29d   : > { %v622_v24 = vpop.f32.mrb[2].mxu0 }
 0x29e   : > { %632 = vrot.lane.b32.xlu0 %v2893_v22, %s2602_s19  ;;  %626 = vrot.lane.b32.xlu1 %v2893_v22, %s2603_s24  ;;  %v2171_v25 = vpop.f32.mrb[3].mxu0 }
 0x2a2   : > { %629 = vrot.lane.b32.xlu1 %v2893_v22, %s2604_s25  ;;  %s1938_s25 = sshll.u32 %s3006_s21, 4  ;;  %s3105_s25 = int_to_ptr.vmem [resolvable:$true] %s1938_s25 }
 0x2a3   : > { %s2488_s18 = scalar_lea.vmem %s3105_s25, 256 }
 0x2a4   : > { %p2489_p2 = scmp.ne.s32.totalorder %s3105_s25, %s2488_s18 }
 0x2a6   : > { %775 = vrot.lane.b32.xlu1 %v2893_v22, %s2605_s20  ;;  %p2490_p4 = pnand %p2489_p2, %p3238_p3 }
 0x2a8   : > { %p2491_p7 = pneg %p2490_p4 }
 0x310   : > { %v2899_v26 = vpop.permute.xlu1 %626  ;;  %v2905_v28 = vpop.permute.xlu0 %632 }
 0x311   : > { %777 = vrot.lane.b32.xlu1 %v2899_v26, %s2605_s20  ;;  %v651_v40 = vcombine.low %v2899_v26, %v2905_v28  ;;  %v652_v41 = vcombine.high %v2899_v26, %v2905_v28 }
 0x313   : > { %v659_v46 = vrot.slane %v651_v40, %v2912_v39  ;;  %v666_v47 = vrot.slane %v652_v41, %v2912_v39 }
 0x314   : > { %v2902_v27 = vpop.permute.xlu1 %629 }
 0x315   : > { %779 = vrot.lane.b32.xlu1 %v2902_v27, %s2605_s20  ;;  %v635_v37 = vcombine.low %v2893_v22, %v2902_v27  ;;  %v636_v38 = vcombine.high %v2893_v22, %v2902_v27 }
 0x317   : > { %v643_v44 = vrot.slane %v635_v37, %v2912_v39  ;;  %v650_v45 = vrot.slane %v636_v38, %v2912_v39 }
 0x318   : > { %v776_v34 = vpop.permute.xlu1 %775 }
 0x319   : > { %781 = vrot.lane.b32.xlu1 %v2905_v28, %s2605_s20  ;;  %v667_v50 = vcombine.low %v643_v44, %v659_v46  ;;  %v668_v51 = vcombine.high %v643_v44, %v659_v46  ;;  %v683_v52 = vcombine.low %v650_v45, %v666_v47  ;;  %v684_v53 = vcombine.high %v650_v45, %v666_v47  ;;  %s2133_s20 = sshll.u32 %s2711_s17, 8 }
 0x31a   : > { %s3110_s29 = scalar_lea.hbm %s3205_s14, %s2133_s20 }
 0x31b   : > { %v675_v59 = vrot.slane %v667_v50, %v2922_v49  ;;  %v682_v60 = vrot.slane %v668_v51, %v2922_v49  ;;  %v691_v61 = vrot.slane %v683_v52, %v2922_v49  ;;  %v698_v62 = vrot.slane %v684_v53, %v2922_v49 }
 0x31d   : > { %v703_v9 = vcombine.low %v675_v59, %v682_v60  ;;  %v2094_v10 = vcombine.high %v675_v59, %v682_v60  ;;  %v719_v11 = vcombine.low %v691_v61, %v698_v62  ;;  %v2095_v12 = vcombine.high %v691_v61, %v698_v62 }
 0x31f   : > { %v710_v21 = vrot.slane %v703_v9, %v2912_v39  ;;  %v718_v23 = vrot.slane %v2094_v10, %v2912_v39  ;;  %v726_v24 = vrot.slane %v719_v11, %v2912_v39  ;;  %v734_v25 = vrot.slane %v2095_v12, %v2912_v39 }
 0x321   : > { %v735_v40 = vcombine.low %v710_v21, %v718_v23  ;;  %v751_v41 = vcombine.low %v726_v24, %v734_v25 }
 0x323   : > { %v759_v50 = vrot.slane %v751_v41, %v2922_v49 }
 0x383   : > { %v778_v42 = vpop.permute.xlu1 %777 }
 0x387   : > { %v780_v48 = vpop.permute.xlu1 %779 }
 0x388   : > { %v787_v54 = vcombine.low %v776_v34, %v780_v48  ;;  %v788_v55 = vcombine.high %v776_v34, %v780_v48  ;;  %v743_v48 = vrot.slane %v735_v40, %v2922_v49 }
 0x38a   : > { %v795_v63 = vrot.slane %v787_v54, %v2912_v39  ;;  %v802_v1 = vrot.slane %v788_v55, %v2912_v39  ;;  %v736_v55 = vcombine.high %v710_v21, %v718_v23 }
 0x38b   : > { %v782_v56 = vpop.permute.xlu1 %781 }
 0x38c   : > { %v803_v57 = vcombine.low %v778_v42, %v782_v56  ;;  %v804_v58 = vcombine.high %v778_v42, %v782_v56  ;;  %v752_v56 = vcombine.high %v726_v24, %v734_v25 }
 0x38e   : > { %v811_v2 = vrot.slane %v803_v57, %v2912_v39  ;;  %v818_v3 = vrot.slane %v804_v58, %v2912_v39  ;;  %v767_v57 = vcombine.low %v743_v48, %v759_v50  ;;  %v768_v58 = vcombine.high %v743_v48, %v759_v50 }
 0x390   : > { %v819_v4 = vcombine.low %v795_v63, %v811_v2  ;;  %v820_v5 = vcombine.high %v795_v63, %v811_v2  ;;  %v835_v6 = vcombine.low %v802_v1, %v818_v3  ;;  %v836_v7 = vcombine.high %v802_v1, %v818_v3 }
 0x391   : > { %v771_v61 = vpack.c.bf16 %v767_v57, %v767_v57  ;;  %v772_v62 = vpack.c.bf16 %v768_v58, %v768_v58  ;;  %v750_v63 = vrot.slane %v736_v55, %v2922_v49  ;;  %v766_v1 = vrot.slane %v752_v56, %v2922_v49 }
 0x392   : > { %v827_v13 = vrot.slane %v819_v4, %v2922_v49  ;;  %v834_v14 = vrot.slane %v820_v5, %v2922_v49  ;;  %v843_v15 = vrot.slane %v835_v6, %v2922_v49  ;;  %v850_v16 = vrot.slane %v836_v7, %v2922_v49 }
 0x393   : > { %v769_v4 = vcombine.low %v750_v63, %v766_v1  ;;  %v770_v5 = vcombine.high %v750_v63, %v766_v1 }
 0x394   : > { %v855_v17 = vcombine.low %v827_v13, %v834_v14  ;;  %v2096_v18 = vcombine.high %v827_v13, %v834_v14  ;;  %v871_v19 = vcombine.low %v843_v15, %v850_v16  ;;  %v2097_v20 = vcombine.high %v843_v15, %v850_v16 }
 0x395   : > { %v773_v6 = vpack.c.bf16 %v769_v4, %v769_v4  ;;  %v774_v7 = vpack.c.bf16 %v770_v5, %v770_v5 }
 0x396   : > { %v862_v29 = vrot.slane %v855_v17, %v2912_v39  ;;  %v870_v30 = vrot.slane %v2096_v18, %v2912_v39  ;;  %v878_v31 = vrot.slane %v871_v19, %v2912_v39  ;;  %v886_v32 = vrot.slane %v2097_v20, %v2912_v39 }
 0x398   : > { %v887_v33 = vcombine.low %v862_v29, %v870_v30  ;;  %v903_v34 = vcombine.low %v878_v31, %v886_v32  ;;  %v888_v35 = vcombine.high %v862_v29, %v870_v30  ;;  %v904_v36 = vcombine.high %v878_v31, %v886_v32 }
 0x39a   : > { %v895_v37 = vrot.slane %v887_v33, %v2922_v49  ;;  %v911_v38 = vrot.slane %v903_v34, %v2922_v49  ;;  %v902_v44 = vrot.slane %v888_v35, %v2922_v49  ;;  %v918_v45 = vrot.slane %v904_v36, %v2922_v49 }
 0x39c   : > { %v919_v42 = vcombine.low %v895_v37, %v911_v38  ;;  %v920_v43 = vcombine.high %v895_v37, %v911_v38  ;;  %v921_v53 = vcombine.low %v902_v44, %v918_v45  ;;  %v922_v54 = vcombine.high %v902_v44, %v918_v45 }
 0x39e   : > { %v923_v46 = vpack.c.bf16 %v919_v42, %v919_v42  ;;  %v924_v47 = vpack.c.bf16 %v920_v43, %v920_v43  ;;  %v925_v59 = vpack.c.bf16 %v921_v53, %v921_v53  ;;  %v926_v60 = vpack.c.bf16 %v922_v54, %v922_v54 }
 0x3a0   : > { %v1084_v51 = vsel %vm1079_vm2, %v923_v46, 0  ;;  %v1130_v52 = vsel %vm1079_vm2, %v924_v47, 0  ;;  %v1176_v2 = vsel %vm1079_vm2, %v925_v59, 0  ;;  %v1222_v3 = vsel %vm1079_vm2, %v926_v60, 0 }
 0x3a1   : > { %2173 = vmatpush3.bf16.xpose.msra.mxu1 %v1084_v51  ;;  %2179 = vmatpush3.bf16.xpose.msra.mxu0 %v1130_v52 }
 0x3a2   : > { %2184 = vmatprep.subr.bf16.mxu1 %v2600_v8  ;;  %2190 = vmatprep.subr.bf16.mxu0 %v2600_v8 }
 0x3a8   : > { %2175 = vmatmul.mubr.msk.bf16.vlgmr.msra.gmra.mrb[0].mxu1 %vm1079_vm2, %v771_v61  ;;  %2181 = vmatmul.mubr.msk.bf16.vlgmr.msra.gmra.mrb[4].mxu0 %vm1079_vm2, %v772_v62 }
 0x3a9   : > { %2185 = vmatpush3.bf16.xpose.msra.mxu1 %v1176_v2  ;;  %2191 = vmatpush3.bf16.xpose.msra.mxu0 %v1222_v3 }
 0x3aa   : > { %2186 = vmatprep.mubr.msk.bf16.mxu1 %vm2601_vm1, %v2600_v8  ;;  %2192 = vmatprep.mubr.msk.bf16.mxu0 %vm2601_vm1, %v2600_v8 }
 0x3ab   : > { %2196 = vmatprep.subr.bf16.mxu1 %v2600_v8  ;;  %2202 = vmatprep.subr.bf16.mxu0 %v2600_v8 }
 0x3b0   : > { %2187 = vmatmul.mubr.msk.bf16.vlgmr.msra.gmra.mrb[4].mxu1 %vm1079_vm2, %v773_v6  ;;  %2193 = vmatmul.mubr.msk.bf16.vlgmr.msra.gmra.mrb[8].mxu0 %vm1079_vm2, %v774_v7 }
 0x3b1   : > { %2198 = vmatprep.mubr.msk.bf16.mxu1 %vm2601_vm1, %v2600_v8  ;;  %2204 = vmatprep.mubr.msk.bf16.mxu0 %vm2601_vm1, %v2600_v8 }
 0x47b   : > { %v1120_v9 = vpop.f32.mrb[0].mxu1  ;;  %v1166_v10 = vpop.f32.mrb[4].mxu0 }
 0x47c   : > { %v2176_v11 = vpop.f32.mrb[1].mxu1  ;;  %v2182_v12 = vpop.f32.mrb[5].mxu0  ;;  %v1264_v13 = vsel %vm1079_vm2, %v1120_v9, -inf  ;;  %v1267_v14 = vsel %vm1079_vm2, %v1166_v10, -inf }
 0x47d   : > { %1265 = vmax.xlane.f32.xlu1 %v1264_v13  ;;  %v1123_v15 = vpop.f32.mrb[2].mxu1  ;;  %1268 = vmax.xlane.f32.xlu0 %v1267_v14  ;;  %v1169_v16 = vpop.f32.mrb[6].mxu0 }
 0x47e   : > { %v2177_v17 = vpop.f32.mrb[3].mxu1  ;;  %v2183_v18 = vpop.f32.mrb[7].mxu0 }
 0x483   : > { %v1212_v19 = vpop.f32.mrb[4].mxu1  ;;  %v1258_v20 = vpop.f32.mrb[8].mxu0 }
 0x484   : > { %v2188_v21 = vpop.f32.mrb[5].mxu1  ;;  %v2194_v23 = vpop.f32.mrb[9].mxu0  ;;  %v1270_v24 = vsel %vm1079_vm2, %v1212_v19, -inf  ;;  %v1273_v25 = vsel %vm1079_vm2, %v1258_v20, -inf }
 0x485   : > { %1271 = vmax.xlane.f32.xlu1 %v1270_v24  ;;  %v1215_v29 = vpop.f32.mrb[6].mxu1  ;;  %1274 = vmax.xlane.f32.xlu0 %v1273_v25  ;;  %v1261_v30 = vpop.f32.mrb[10].mxu0 }
 0x486   : > { %v2189_v31 = vpop.f32.mrb[7].mxu1  ;;  %v2195_v32 = vpop.f32.mrb[11].mxu0 }
 0x496   : > { %927 = vrot.lane.b32.xlu1 %v2893_v22, %s2608_s28 }
 0x50a   : > { %v1266_v33 = vpop.xlane.xlu1 %1265  ;;  %v1269_v34 = vpop.xlane.xlu0 %1268 }
 0x50b   : > { %v1276_v35 = vsub.f32 %v1120_v9, %v1266_v33  ;;  %v1277_v36 = vsub.f32 %v1166_v10, %v1269_v34 }
 0x50d   : > { %v1280_v37 = vmul.f32 1.442695, %v1276_v35  ;;  %v1282_v38 = vmul.f32 1.442695, %v1277_v36 }
 0x50f   : > { %2358 = vpow2.f32 %v1280_v37 }
 0x510   : > { %2360 = vpow2.f32 %v1282_v38 }
 0x512   : > { %v1272_v22 = vpop.xlane.xlu1 %1271  ;;  %v1275_v45 = vpop.xlane.xlu0 %1274 }
 0x513   : > { %v1278_v44 = vsub.f32 %v1212_v19, %v1272_v22  ;;  %v1279_v46 = vsub.f32 %v1258_v20, %v1275_v45 }
 0x515   : > { %v1284_v47 = vmul.f32 1.442695, %v1278_v44  ;;  %v1286_v48 = vmul.f32 1.442695, %v1279_v46 }
 0x517   : > { %2362 = vpow2.f32 %v1284_v47 }
 0x518   : > { %2364 = vpow2.f32 %v1286_v48 }
 0x519   : > { %v2359_v40 = vpop.eup %2358 }
 0x51a   : > { %v2361_v41 = vpop.eup %2360  ;;  %v1288_v42 = vsel %vm1079_vm2, %v2359_v40, 0.0 }
 0x51b   : > { %1289 = vadd.xlane.f32.xlu1 %v1288_v42  ;;  %v1291_v43 = vsel %vm1079_vm2, %v2361_v41, 0.0 }
 0x51c   : > { %1292 = vadd.xlane.f32.xlu0 %v1291_v43 }
 0x521   : > { %v2986_v50 = vpop.eup %2362 }
 0x522   : > { %v2988_v51 = vpop.eup %2364 }
 0x52c   : > { %931 = vrot.lane.b32.xlu1 %v2902_v27, %s2608_s28  ;;  %v1294_v27 = vsel %vm1079_vm2, %v2986_v50, 0.0 }
 0x530   : > { %933 = vrot.lane.b32.xlu1 %v2905_v28, %s2608_s28  ;;  %v928_v28 = vpop.permute.xlu1 %927 }
 0x532   : > { %929 = vrot.lane.b32.xlu0 %v2899_v26, %s2608_s28  ;;  %v1297_v26 = vsel %vm1079_vm2, %v2988_v51, 0.0 }
 0x551   : > { %1295 = vadd.xlane.f32.xlu0 %v1294_v27 }
 0x554   : > { %1298 = vadd.xlane.f32.xlu1 %v1297_v26 }
 0x5a8   : > { %v1290_v52 = vpop.xlane.xlu1 %1289 }
 0x5a9   : > { %2366 = vrcp.f32 %v1290_v52  ;;  %v1293_v53 = vpop.xlane.xlu0 %1292 }
 0x5aa   : > { %2368 = vrcp.f32 %v1293_v53 }
 0x5ac   : > { %v932_v54 = vpop.permute.xlu1 %931 }
 0x5ad   : > { %v939_v55 = vcombine.low %v928_v28, %v932_v54  ;;  %v940_v56 = vcombine.high %v928_v28, %v932_v54  ;;  %v930_v57 = vpop.permute.xlu0 %929 }
 0x5af   : > { %v947_v62 = vrot.slane %v939_v55, %v2912_v39  ;;  %v954_v63 = vrot.slane %v940_v56, %v2912_v39 }
 0x5b0   : > { %v934_v58 = vpop.permute.xlu1 %933 }
 0x5b1   : > { %v955_v59 = vcombine.low %v930_v57, %v934_v58  ;;  %v956_v60 = vcombine.high %v930_v57, %v934_v58 }
 0x5b3   : > { %v2367_v61 = vpop.eup %2366  ;;  %v963_v1 = vrot.slane %v955_v59, %v2912_v39  ;;  %v970_v2 = vrot.slane %v956_v60, %v2912_v39 }
 0x5b4   : > { %v2369_v3 = vpop.eup %2368  ;;  %v1304_v4 = vmul.f32 %v2367_v61, %v2359_v40 }
 0x5b5   : > { %v1305_v5 = vmul.f32 %v2369_v3, %v2361_v41  ;;  %v971_v6 = vcombine.low %v947_v62, %v963_v1  ;;  %v972_v7 = vcombine.high %v947_v62, %v963_v1  ;;  %v987_v9 = vcombine.low %v954_v63, %v970_v2 }
 0x5b6   : > { %v988_v10 = vcombine.high %v954_v63, %v970_v2  ;;  %v1308_v11 = vpack.c.bf16 %v1304_v4, %v1304_v4 }
 0x5b7   : > { %v979_v12 = vrot.slane %v971_v6, %v2922_v49  ;;  %v986_v13 = vrot.slane %v972_v7, %v2922_v49  ;;  %v995_v14 = vrot.slane %v987_v9, %v2922_v49  ;;  %v1309_v15 = vpack.c.bf16 %v1305_v5, %v1305_v5 }
 0x5b8   : > { %v1002_v16 = vrot.slane %v988_v10, %v2922_v49  ;;  %1313 = vst.msk [vmem:[%s3006_s21] sm:$0xf] %vm1312_vm3, %v1308_v11 }
 0x5b9   : > { %v1007_v17 = vcombine.low %v979_v12, %v986_v13  ;;  %v2098_v18 = vcombine.high %v979_v12, %v986_v13  ;;  %1314 = vst.msk [vmem:[%s3006_s21 + $0x4] sm:$0xf] %vm1312_vm3, %v1309_v15 }
 0x5ba   : > { %v1023_v19 = vcombine.low %v995_v14, %v1002_v16  ;;  %v2099_v20 = vcombine.high %v995_v14, %v1002_v16 }
 0x5bb   : > { %v1014_v21 = vrot.slane %v1007_v17, %v2912_v39  ;;  %v1022_v23 = vrot.slane %v2098_v18, %v2912_v39 }
 0x5bc   : > { %v1030_v24 = vrot.slane %v1023_v19, %v2912_v39  ;;  %v1038_v25 = vrot.slane %v2099_v20, %v2912_v39 }
 0x5bd   : > { %v1039_v29 = vcombine.low %v1014_v21, %v1022_v23  ;;  %v1040_v30 = vcombine.high %v1014_v21, %v1022_v23  ;;  %v2349_v23 = vld [vmem:[%s3196_s5 + $0x8] sm:$0xff]  }
 0x5be   : > { %v1055_v31 = vcombine.low %v1030_v24, %v1038_v25  ;;  %v1056_v32 = vcombine.high %v1030_v24, %v1038_v25 }
 0x5bf   : > { %v1047_v33 = vrot.slane %v1039_v29, %v2922_v49  ;;  %v1054_v34 = vrot.slane %v1040_v30, %v2922_v49 }
 0x5c0   : > { %v1063_v35 = vrot.slane %v1055_v31, %v2922_v49  ;;  %v1070_v36 = vrot.slane %v1056_v32, %v2922_v49 }
 0x5c2   : > { %v1071_v37 = vcombine.low %v1047_v33, %v1063_v35  ;;  %v1072_v38 = vcombine.high %v1047_v33, %v1063_v35  ;;  %v1073_v40 = vcombine.low %v1054_v34, %v1070_v36  ;;  %v1074_v41 = vcombine.high %v1054_v34, %v1070_v36 }
 0x5c4   : > { %v1075_v42 = vpack.c.bf16 %v1071_v37, %v1071_v37  ;;  %v1076_v43 = vpack.c.bf16 %v1072_v38, %v1072_v38  ;;  %v1077_v45 = vpack.c.bf16 %v1073_v40, %v1073_v40  ;;  %v1078_v46 = vpack.c.bf16 %v1074_v41, %v1074_v41 }
 0x5c6   : > { %v1322_v22 = vsel %vm1320_vm4, %v1075_v42, 0  ;;  %v1368_v44 = vsel %vm1320_vm4, %v1076_v43, 0  ;;  %v1414_v47 = vsel %vm1320_vm4, %v1077_v45, 0  ;;  %v1460_v48 = vsel %vm1320_vm4, %v1078_v46, 0 }
 0x5c7   : > { %2197 = vmatpush3.bf16.msra.mxu1 %v1322_v22  ;;  %2203 = vmatpush3.bf16.msra.mxu0 %v1368_v44 }
 0x5c8   : > { %2208 = vmatprep.subr.bf16.mxu1 %v2600_v8  ;;  %2214 = vmatprep.subr.bf16.mxu0 %v2600_v8 }
 0x5ca   : > { %2199 = vmatmul.mubr.msk.bf16.vlgmr.msra.gmra.mrb[8].mxu1 %vm1079_vm2, %v1308_v11  ;;  %2205 = vmatmul.mubr.msk.bf16.vlgmr.msra.gmra.mrb[12].mxu0 %vm1079_vm2, %v1309_v15 }
 0x5cb   : > { %2209 = vmatpush3.bf16.msra.mxu1 %v1414_v47  ;;  %2215 = vmatpush3.bf16.msra.mxu0 %v1460_v48 }
 0x5cc   : > { %2210 = vmatprep.mubr.msk.bf16.mxu1 %vm2601_vm1, %v2600_v8  ;;  %2216 = vmatprep.mubr.msk.bf16.mxu0 %vm2601_vm1, %v2600_v8 }
 0x5cd   : > { %2220 = vmatprep.subr.bf16.mxu1 %v2600_v8  ;;  %2228 = vmatprep.subr.bf16.mxu0 %v2600_v8 }
 0x5de   : > { %v1296_v27 = vpop.xlane.xlu0 %1295 }
 0x5df   : > { %2370 = vrcp.f32 %v1296_v27 }
 0x5e1   : > { %v1299_v26 = vpop.xlane.xlu1 %1298 }
 0x5e2   : > { %2372 = vrcp.f32 %v1299_v26 }
 0x5e9   : > { %v2371_v28 = vpop.eup %2370 }
 0x5ea   : > { %v1306_v52 = vmul.f32 %v2371_v28, %v2986_v50  ;;  %v2348_v50 = vld [vmem:[%s3196_s5] sm:$0xff]  }
 0x5ec   : > { %v2373_v53 = vpop.eup %2372  ;;  %v1310_v54 = vpack.c.bf16 %v1306_v52, %v1306_v52 }
 0x5ed   : > { %v1307_v55 = vmul.f32 %v2373_v53, %v2988_v51 }
 0x5ee   : > { %2211 = vmatmul.mubr.msk.bf16.vlgmr.msra.gmra.mrb[12].mxu1 %vm1079_vm2, %v1310_v54  ;;  %1315 = vst.msk [vmem:[%s3006_s21 + $0x8] sm:$0xf] %vm1312_vm3, %v1310_v54 }
 0x5ef   : > { %v1311_v56 = vpack.c.bf16 %v1307_v55, %v1307_v55  ;;  %2224 = vmatprep.mubr.msk.bf16.mxu1 %vm2601_vm1, %v2600_v8  ;;  %2221 = vmatpush3.bf16.msra.mxu1 %v2348_v50 }
 0x5f0   : > { %2222 = vmatprep.subr.bf16.mxu1 %v2600_v8 }
 0x5f1   : > { %2217 = vmatmul.mubr.msk.bf16.vlgmr.msra.gmra.mrb[16].mxu0 %vm1079_vm2, %v1311_v56  ;;  %1316 = vst.msk [vmem:[%s3006_s21 + $0xc] sm:$0xf] %vm1312_vm3, %v1311_v56  ;;  %v2110_v56 = vld [vmem:[#allocation5] ss:$0 sm:$0xff] }
 0x5f2   : > { %2232 = vmatprep.mubr.msk.bf16.mxu0 %vm2601_vm1, %v2600_v8 }
 0x5f3   : > { %2223 = vmatpush3.bf16.msra.mxu1 %v2349_v23 }
 0x5f4   : > { %2236 = vmatprep.subr.bf16.mxu1 %v2600_v8 }
 0x69d   : > { %v1358_v51 = vpop.f32.mrb[8].mxu1  ;;  %v1404_v57 = vpop.f32.mrb[12].mxu0 }
 0x69e   : > { %v2200_v58 = vpop.f32.mrb[9].mxu1  ;;  %v2206_v59 = vpop.f32.mrb[13].mxu0 }
 0x69f   : > { %v1361_v60 = vpop.f32.mrb[10].mxu1  ;;  %v1407_v61 = vpop.f32.mrb[14].mxu0 }
 0x6a0   : > { %v2201_v62 = vpop.f32.mrb[11].mxu1  ;;  %v2207_v63 = vpop.f32.mrb[15].mxu0 }
 0x6c1   : > { %v1450_v1 = vpop.f32.mrb[12].mxu1 }
 0x6c2   : > { %v1502_v2 = vcombine.low %v1358_v51, %v1450_v1  ;;  %v1503_v3 = vcombine.high %v1358_v51, %v1450_v1  ;;  %v2212_v4 = vpop.f32.mrb[13].mxu1 }
 0x6c3   : > { %v1453_v5 = vpop.f32.mrb[14].mxu1  ;;  %v2350_v4 = vld [vmem:[%s3200_s9] sm:$0xff]  }
 0x6c4   : > { %v2213_v6 = vpop.f32.mrb[15].mxu1  ;;  %v1496_v7 = vpop.f32.mrb[16].mxu0  ;;  %v1510_v13 = vrot.slane %v1502_v2, %v2912_v39  ;;  %v1517_v14 = vrot.slane %v1503_v3, %v2912_v39  ;;  %2229 = vmatpush3.bf16.msra.mxu0 %v2350_v4  ;;  %v2352_v5 = vld [vmem:[%s3202_s11] sm:$0xff]  }
 0x6c5   : > { %v1518_v9 = vcombine.low %v1404_v57, %v1496_v7  ;;  %v1519_v10 = vcombine.high %v1404_v57, %v1496_v7  ;;  %v2218_v11 = vpop.f32.mrb[17].mxu0  ;;  %2230 = vmatprep.subr.bf16.mxu0 %v2600_v8  ;;  %v2353_v6 = vld [vmem:[%s3202_s11 + $0x8] sm:$0xff]  }
 0x6c6   : > { %v1499_v12 = vpop.f32.mrb[18].mxu0 }
 0x6c7   : > { %v1526_v15 = vrot.slane %v1518_v9, %v2912_v39  ;;  %v1533_v16 = vrot.slane %v1519_v10, %v2912_v39  ;;  %v2219_v17 = vpop.f32.mrb[19].mxu0  ;;  %v2114_v12 = vld [vmem:[#allocation7] ss:$0 sm:$0xff] }
 0x6c9   : > { %v1534_v18 = vcombine.low %v1510_v13, %v1526_v15  ;;  %v1535_v19 = vcombine.high %v1510_v13, %v1526_v15  ;;  %v1550_v20 = vcombine.low %v1517_v14, %v1533_v16  ;;  %v1551_v21 = vcombine.high %v1517_v14, %v1533_v16  ;;  %v2115_v14 = vld [vmem:[#allocation8] ss:$0 sm:$0xff] }
 0x6cb   : > { %v1542_v24 = vrot.slane %v1534_v18, %v2922_v49  ;;  %v1549_v25 = vrot.slane %v1535_v19, %v2922_v49  ;;  %v1558_v29 = vrot.slane %v1550_v20, %v2922_v49  ;;  %v1565_v30 = vrot.slane %v1551_v21, %v2922_v49  ;;  %v2354_v18 = vld [vmem:[%s3202_s11 + $0x10] sm:$0xff]   ;;  %v2355_v19 = vld [vmem:[%s3202_s11 + $0x18] sm:$0xff]   ;;  %v2116_v20 = vld [vmem:[%s3201_s10] ss:$0 sm:$0xff] }
 0x6cd   : > { %v1570_v31 = vcombine.low %v1542_v24, %v1549_v25  ;;  %v2108_v32 = vcombine.high %v1542_v24, %v1549_v25  ;;  %v1586_v33 = vcombine.low %v1558_v29, %v1565_v30  ;;  %v2109_v34 = vcombine.high %v1558_v29, %v1565_v30 }
 0x6cf   : > { %v1577_v35 = vrot.slane %v1570_v31, %v2912_v39  ;;  %v1585_v36 = vrot.slane %v2108_v32, %v2912_v39  ;;  %v1593_v37 = vrot.slane %v1586_v33, %v2912_v39  ;;  %v1601_v38 = vrot.slane %v2109_v34, %v2912_v39 }
 0x6d1   : > { %v1603_v40 = vcombine.high %v1577_v35, %v1585_v36  ;;  %v1619_v41 = vcombine.high %v1593_v37, %v1601_v38  ;;  %v1602_v42 = vcombine.low %v1577_v35, %v1585_v36  ;;  %v1618_v43 = vcombine.low %v1593_v37, %v1601_v38 }
 0x6d3   : > { %v1617_v22 = vrot.slane %v1603_v40, %v2922_v49  ;;  %v1633_v44 = vrot.slane %v1619_v41, %v2922_v49  ;;  %v1610_v45 = vrot.slane %v1602_v42, %v2922_v49  ;;  %v1626_v46 = vrot.slane %v1618_v43, %v2922_v49 }
 0x6d5   : > { %v1636_v47 = vcombine.low %v1617_v22, %v1633_v44  ;;  %v1635_v48 = vcombine.high %v1610_v45, %v1626_v46  ;;  %v1637_v27 = vcombine.high %v1617_v22, %v1633_v44  ;;  %v1634_v26 = vcombine.low %v1610_v45, %v1626_v46 }
 0x6d7   : > { %1643 = vrot.lane.b32.xlu1 %v1636_v47, %s2609_s12  ;;  %1639 = vrot.lane.b32.xlu0 %v1635_v48, %s2610_s22  ;;  %s2612_s12 = smov [#allocation11]  }
 0x6d8   : > { %s2492_s22 = sshll.u32 %s2612_s12, 4  ;;  %s2493_s22 = int_to_ptr.vmem [resolvable:$false] %s2492_s22 }
 0x6d9   : > { %s2494_s21 = scalar_lea.vmem %s2493_s22, 512  ;;  %p2495_p8 = scmp.lt.s32.totalorder %s3105_s25, %s2493_s22 }
 0x6da   : > { %p2496_p11 = scmp.lt.s32.totalorder %s2494_s21, %s2488_s18 }
 0x6db   : > { %1647 = vrot.lane.b32.xlu0 %v1637_v27, %s2611_s13 }
 0x6dc   : > { %p2497_p13 = por %p2496_p11, %p2495_p8 }
 0x6de   : > { %p2498_p1 = pnand %p2497_p13, %p2491_p7 }
 0x749   : > { %v1640_v39 = vpop.permute.xlu0 %1639  ;;  %v1644_v28 = vpop.permute.xlu1 %1643 }
 0x74a   : > { %v1650_v52 = vsel %vm1079_vm2, %v1634_v26, %v1640_v39 }
 0x74b   : > { %v1652_v54 = vsel %vm1651_vm5, %v1650_v52, %v1644_v28 }
 0x74d   : > { %v1648_v53 = vpop.permute.xlu0 %1647 }
 0x74e   : > { %v1654_v55 = vsel %vm1653_vm6, %v1652_v54, %v1648_v53 }
 0x74f   : > { %v1655_v49 = vpack.c.bf16 %v1654_v55, %v1654_v55 }
 0x751   : > { %2225 = vmatmul.mubr.msk.bf16.vlgmr.msra.gmra.mrb[16].mxu1 %vm529_vm0, %v1655_v49 }
 0x752   : > { %2244 = vmatprep.mubr.msk.bf16.mxu1 %vm2601_vm1, %v2600_v8  ;;  %2237 = vmatpush3.bf16.msra.mxu1 %v2352_v5 }
 0x753   : > { %2238 = vmatprep.subr.bf16.mxu1 %v2600_v8 }
 0x756   : > { %2239 = vmatpush3.bf16.msra.mxu1 %v2353_v6 }
 0x757   : > { %2240 = vmatprep.subr.bf16.mxu1 %v2600_v8 }
 0x75a   : > { %2241 = vmatpush3.bf16.msra.mxu1 %v2354_v18 }
 0x75b   : > { %2242 = vmatprep.subr.bf16.mxu1 %v2600_v8 }
 0x75e   : > { %2243 = vmatpush3.bf16.msra.mxu1 %v2355_v19 }
 0x824   : > { %v1716_v50 = vpop.f32.mrb[16].mxu1 }
 0x825   : > { %v1717_v51 = vadd.f32 %v2110_v56, %v1716_v50  ;;  %v2226_v57 = vpop.f32.mrb[17].mxu1 }
 0x826   : > { %v1719_v58 = vpop.f32.mrb[18].mxu1 }
 0x827   : > { %v3071_v59 = vadd.f32 %v1717_v51, %v2864_v0  ;;  %v2227_v60 = vpop.f32.mrb[19].mxu1  ;;  %v2351_v0 = vld [vmem:[%s3200_s9 + $0x8] sm:$0xff]  }
 0x828   : > { %2231 = vmatpush3.bf16.msra.mxu0 %v2351_v0 }
 0x829   : > { %v1725_v61 = vsel %vm529_vm0, %v3071_v59, 0.0 }
 0x82a   : > { %1726 = vadd.xlane.f32.xlu1 %v1725_v61 }
 0x8b7   : > { %v1727_v62 = vpop.xlane.xlu1 %1726 }
 0x8b8   : > { %v1728_v63 = vmul.f32 0.03125, %v1727_v62 }
 0x8ba   : > { %v1729_v1 = vsub.f32 %v3071_v59, %v1728_v63 }
 0x8bc   : > { %v1730_v2 = vmul.f32 %v1729_v1, %v1729_v1 }
 0x8be   : > { %v1731_v3 = vsel %vm529_vm0, %v1730_v2, 0.0 }
 0x8bf   : > { %1732 = vadd.xlane.f32.xlu0 %v1731_v3 }
 0x94c   : > { %v1733_v7 = vpop.xlane.xlu0 %1732 }
 0x94d   : > { %v1734_v9 = vmul.f32 0.03125, %v1733_v7 }
 0x94f   : > { %v1735_v10 = vadd.f32 1e-05, %v1734_v9 }
 0x951   : > { %2374 = vrsqrt.f32 %v1735_v10 }
 0x95b   : > { %v2375_v11 = vpop.eup %2374 }
 0x95c   : > { %v1737_v13 = vmul.f32 %v2375_v11, %v1729_v1 }
 0x95e   : > { %v1744_v15 = vmul.f32 %v2114_v12, %v1737_v13 }
 0x960   : > { %v1751_v16 = vadd.f32 %v2115_v14, %v1744_v15 }
 0x962   : > { %v1752_v17 = vpack.c.bf16 %v1751_v16, %v1751_v16 }
 0x964   : > { %2233 = vmatmul.mubr.msk.bf16.vlgmr.msra.gmra.mrb[20].mxu0 %vm529_vm0, %v1752_v17 }
 0xa37   : > { %v1813_v21 = vpop.f32.mrb[20].mxu0 }
 0xa38   : > { %v1814_v23 = vadd.f32 %v2116_v20, %v1813_v21  ;;  %v2234_v24 = vpop.f32.mrb[21].mxu0 }
 0xa39   : > { %v1816_v25 = vpop.f32.mrb[22].mxu0 }
 0xa3a   : > { %v1819_v29 = vmax.f32 %v1814_v23, 0.0  ;;  %v2235_v30 = vpop.f32.mrb[23].mxu0 }
 0xa3c   : > { %v1820_v31 = vpack.c.bf16 %v1819_v29, %v1819_v29 }
 0xa3e   : > { %2245 = vmatmul.mubr.msk.bf16.vlgmr.msra.gmra.mrb[20].mxu1 %vm1860_vm7, %v1820_v31 }
 0xa3f   : > { %2501 = shalt.err (!%p2498_p1)
}
 0xa40   : > { %s2502_s13 = scalar_lea.hbm %s3110_s29, 256  ;;  %s2506_s20 = scalar_lea.hbm %s3205_s14, 512 }
 0xa41   : > { %p2503_p0 = scmp.ne.s32.totalorder %s3110_s29, %s2502_s13  ;;  %p2507_p9 = scmp.lt.u32.totalorder %s3110_s29, %s3205_s14 }
 0xa42   : > { %p2508_p12 = scmp.lt.u32.totalorder %s2506_s20, %s2502_s13  ;;  %p2510_p2 = scmp.lt.u32.totalorder %s2502_s13, %s3110_s29 }
 0xa43   : > { %p2504_p6 = pnand %p2503_p0, %p3238_p3 }
 0xa44   : > { %p2509_p10 = por %p2508_p12, %p2507_p9 }
 0xa45   : > { %p2505_p5 = pneg %p2504_p6 }
 0xa46   : > { %p2511_p4 = por %p2510_p2, %p2509_p10 }
 0xa48   : > { %p2512_p7 = pnand %p2511_p4, %p2505_p5 }
 0xa4a   : > { %2515 = shalt.err (!%p2512_p7)
}
 0xa4b   : > { %s2613_s18 = smov 4   ;;  %s2085_s12 = sshll.u32 %s2995_s16, 3 }
 0xa4c   : > { %2265 = dma.vmem_to_hbm [thread:$0]  (%p3238_p3), %s3105_s25, 256, %s3110_s29, %s1912_s27, %s2608_s28, %s2608_s28, %s2613_s18  }
 0xa4d   : > { %s3239_s13 = sld [smem:[#allocation25_spill]]  ;;  %s2128_s19 = sshll.u32 %s2711_s17, 7 }
 0xa4e   : > { %s513_s24 = scalar_lea.vmem [#allocation10], %s2085_s12  ;;  %s3240_s0 = sld [smem:[#allocation26_spill]] }
 0xa4f   : > { %s1925_s20 = sshll.u32 %s513_s24, 4  ;;  %s1907_s17 = scalar_lea.sflag [#allocation4], %s2995_s16  ;;  %s3149_s20 = int_to_ptr.vmem [resolvable:$true] %s1925_s20 }
 0xa50   : > { %s2516_s25 = scalar_lea.vmem %s3149_s20, 128  ;;  %s2614_s29 = smov [#allocation10]  }
 0xa51   : > { %p2517_p8 = scmp.ne.s32.totalorder %s3149_s20, %s2516_s25  ;;  %s2520_s27 = sshll.u32 %s2614_s29, 4  ;;  %s2521_s27 = int_to_ptr.vmem [resolvable:$false] %s2520_s27 }
 0xa52   : > { %s2522_s18 = scalar_lea.vmem %s2521_s27, 256  ;;  %p2523_p1 = scmp.lt.s32.totalorder %s3149_s20, %s2521_s27 }
 0xa53   : > { %v2120_v8 = vld [vmem:[%s3239_s13] ss:$0 sm:$0xff]  ;;  %p2518_p11 = pnand %p2517_p8, %p3238_p3  ;;  %p2524_p0 = scmp.lt.s32.totalorder %s2522_s18, %s2516_s25 }
 0xa54   : > { %s3147_s28 = scalar_lea.hbm %s3240_s0, %s2128_s19 }
 0xa55   : > { %p2519_p13 = pneg %p2518_p11  ;;  %p2525_p6 = por %p2524_p0, %p2523_p1 }
 0xa57   : > { %p2526_p5 = pnand %p2525_p6, %p2519_p13 }
 0xb11   : > { %v1898_v32 = vpop.f32.mrb[20].mxu1 }
 0xb12   : > { %v1899_v33 = vadd.f32 %v2120_v8, %v1898_v32  ;;  %v2246_v34 = vpop.f32.mrb[21].mxu1 }
 0xb13   : > { %v1901_v35 = vpop.f32.mrb[22].mxu1 }
 0xb14   : > { %v1904_v36 = vadd.f32 %v1899_v33, %v3071_v59  ;;  %v2247_v37 = vpop.f32.mrb[23].mxu1 }
 0xb16   : > { %1905 = vst.msk [vmem:[%s513_s24] sm:$0xff] %vm529_vm0, %v1904_v36 }
 0xb17   : > { %2529 = shalt.err (!%p2526_p5)
}
 0xb18   : > { %s2530_s16 = scalar_lea.hbm %s3147_s28, 128  ;;  %s2534_s21 = scalar_lea.hbm %s3240_s0, 256 }
 0xb19   : > { %p2531_p9 = scmp.ne.s32.totalorder %s3147_s28, %s2530_s16  ;;  %p2535_p2 = scmp.lt.u32.totalorder %s3147_s28, %s3240_s0 }
 0xb1a   : > { %p2536_p4 = scmp.lt.u32.totalorder %s2534_s21, %s2530_s16  ;;  %p2538_p8 = scmp.lt.u32.totalorder %s2530_s16, %s3147_s28 }
 0xb1b   : > { %p2532_p12 = pnand %p2531_p9, %p3238_p3 }
 0xb1c   : > { %p2537_p7 = por %p2536_p4, %p2535_p2 }
 0xb1d   : > { %p2533_p10 = pneg %p2532_p12 }
 0xb1e   : > { %p2539_p11 = por %p2538_p8, %p2537_p7 }
 0xb20   : > { %p2540_p13 = pnand %p2539_p11, %p2533_p10 }
 0xb22   : > { %2543 = shalt.err (!%p2540_p13)
}
 0xb23   : > { %2264 = dma.vmem_to_hbm [thread:$0]  (%p3238_p3), %s3149_s20, 128, %s3147_s28, %s1907_s17  }
 0xb24 PF: > { %s3241_s24 = sld [smem:[#allocation20_spill]]  ;;  %s3242_s26 = sld [smem:[#allocation18_spill]] }
 0xb25   : > { %s3243_s15 = sld [smem:[#allocation23_spill]] }
 0xb2a   : > { %p2296_p1 = scmp.ge.s32.totalorder %s3241_s24, 2  ;;  %s1953_s25 = sand.u32 1, %s3242_s26  }
 0xb2b   : > { %p3244_p0 = scmp.ne.s32.totalorder %s3243_s15, 0  ;;  %s1954_s29 = scalar_lea.sflag [#allocation4], %s1953_s25 }
 0xb2d   : > { %p2282_p6 = pnand %p2296_p1, %p3244_p0 }
 0xb2f   : > { %2573 = dma.done.wait (!%p2282_p6), %s1954_s29, 128  }
 0xb30   : > { %2575 = vsyncadd (!%p2282_p6), %s1954_s29, 4294967168  ;;  %s1963_s27 = scalar_lea.sflag [#allocation12], %s1953_s25 }
 0xb31   : > { %2577 = dma.done.wait (!%p2282_p6), %s1963_s27, 256  }
 0xb32   : > { %2579 = vsyncadd (!%p2282_p6), %s1963_s27, 4294967040  ;;  %s3245_s16 = sld [smem:[#allocation21_spill]]  ;;  %s3246_s23 = sld [smem:[#allocation19_spill]] }
 0xb33   : > { %s3247_s15 = sld [smem:[#allocation22_spill]]  ;;  %s3248_s29 = smov %s2586_s30 }
 0xb38   : > { %p31_p3 = scmp.ge.s32.totalorder %s3245_s16, 4   ;;  %s3249_s30 = smov %s3246_s23 }
 0xb3a   :  { %33 = sbr.rel (!%p31_p3) target bundleno = 12 (0xc), region = 141 }
 0xb41   :  { %1968 = vsyncpa [#allocation3], 1 }
 0xb42   :  { %1970 = vsyncpa [#allocation3 + $0x1], 1 }
 0xb43   :  { %1971 = vsyncpa [#allocation6], 1 }
 0xb44   :  { %1972 = vsyncpa [#allocation9], 1 }
 0xb45   :  { %1973 = vsyncpa [#allocation4], 1 }
 0xb46   :  { %1975 = vsyncpa [#allocation4 + $0x1], 1 }
 0xb47   :  { %1976 = vsyncpa [#allocation12], 1 }
 0xb48   :  { %1978 = vsyncpa [#allocation12 + $0x1], 1 }

// kernel: tpu_custom_call.1
= control target key start
LH: loop header
LB: loop body
LE: loop exit
PB: predicated region body
PF: predicated region fallthrough
CT: control target
= control target key end

     0   :  { %s3191_s0 = inlined_call_operand.vmem [shape: f32[2,8,32], index: 0, kind: input, shape index: {}]   ;;  %s3192_s1 = inlined_call_operand.vmem [shape: f32[1,32], index: 1, kind: input, shape index: {}]   ;;  %s3193_s2 = inlined_call_operand.vmem [shape: f32[1,32], index: 2, kind: input, shape index: {}]   ;;  %s3194_s3 = inlined_call_operand.vmem [shape: bf16[32,96], index: 3, kind: input, shape index: {}]   ;;  %s3195_s4 = inlined_call_operand.hbm [shape: f32[1,96], index: 4, kind: input, shape index: {}]   ;;  %s3196_s5 = inlined_call_operand.vmem [shape: bf16[32,32], index: 5, kind: input, shape index: {}]   ;;  %s3197_s6 = inlined_call_operand.hbm [shape: f32[1,32], index: 6, kind: input, shape index: {}]   ;;  %s3198_s7 = inlined_call_operand.hbm [shape: f32[1,32], index: 7, kind: input, shape index: {}]   ;;  %s3199_s8 = inlined_call_operand.hbm [shape: f32[1,32], index: 8, kind: input, shape index: {}]   ;;  %s3200_s9 = inlined_call_operand.vmem [shape: bf16[32,64], index: 9, kind: input, shape index: {}]   ;;  %s3201_s10 = inlined_call_operand.vmem [shape: f32[1,64], index: 10, kind: input, shape index: {}]   ;;  %s3202_s11 = inlined_call_operand.vmem [shape: bf16[64,32], index: 11, kind: input, shape index: {}]   ;;  %s3203_s12 = inlined_call_operand.vmem [shape: f32[1,32], index: 12, kind: input, shape index: {}]   ;;  %s3204_s13 = inlined_call_operand.hbm [shape: f32[2,8,32], index: 13, kind: output, shape index: {0}]   ;;  %s3205_s14 = inlined_call_operand.hbm [shape: bf16[2,4,8,8], index: 14, kind: output, shape index: {1}]  }
   0x1   :  { %3216 = sst [smem:[#allocation24_spill]] %s3191_s0 }
   0x2   :  { %3217 = sst [smem:[#allocation25_spill]] %s3203_s12 }
   0x3   :  { %3218 = sst [smem:[#allocation26_spill]] %s3204_s13 }
   0x4   :  { %20 = vsyncpa [#allocation3], 0 }
   0x5   :  { %21 = vsyncpa [#allocation6], 0 }
   0x6   :  { %22 = vsyncpa [#allocation9], 0 }
   0x7   :  { %23 = vsyncpa [#allocation4], 0 }
   0x8   :  { %25 = vsyncpa [#allocation4 + $0x1], 0 }
   0x9   :  { %26 = vsyncpa [#allocation12], 0 }
   0xa   :  { %28 = vsyncpa [#allocation12 + $0x1], 0  ;;  %s2690_s29 = smov 0   ;;  %s2692_s30 = smov 0  }
   0xb   :  { %s2694_s15 = smov 0   ;;  %s2696_s16 = smov 0  }
   0xc LB: > { %3219 = sst [smem:[#allocation18_spill]] %s2582_s29  ;;  %s2711_s17 = sadd.s32 4294967295, %s2594_s16   ;;  %s2594_s16 = sphi %s2696_s16, %s3245_s16   ;;  %s2590_s15 = sphi %s2694_s15, %s3247_s15   ;;  %s2586_s30 = sphi %s2692_s30, %s3249_s30   ;;  %s2582_s29 = sphi %s2690_s29, %s3248_s29  }
   0xd   : > { %3220 = sst [smem:[#allocation19_spill]] %s2590_s15  ;;  %s2073_s18 = sadd.s32 4294967294, %s2594_s16  }
   0xe   : > { %3221 = sst [smem:[#allocation20_spill]] %s2594_s16  ;;  %s2715_s19 = sadd.s32 1, %s2594_s16  }
   0xf   : > { %3222 = sst [smem:[#allocation21_spill]] %s2715_s19  ;;  %s319_s20 = sadd.s32 1, %s2590_s15 }
  0x10   : > { %s316_s21 = ssub.s32 %s2594_s16, %s2715_s19  ;;  %p329_p0 = scmp.ne.s32.totalorder %s2590_s15, %s2586_s30 }
  0x11   : > { %p317_p1 = scmp.eq.s32.totalorder %s316_s21, 0  ;;  %p330_p2 = scmp.eq.s32.totalorder %s2711_s17, 1 }
  0x12   : > { %p335_p3 = scmp.ne.s32.totalorder %s2586_s30, %s2582_s29  ;;  %p336_p4 = scmp.eq.s32.totalorder %s2073_s18, 1 }
  0x13   : > { %s2726_s22 = scalar_select %p317_p1, %s2590_s15, %s319_s20  }
  0x14   : > { %p2728_p5 = por %p330_p2, %p329_p0  ;;  %p2732_p6 = por %p336_p4, %p335_p3 }
  0x15   : > { %3223 = sst [smem:[#allocation22_spill]] %s2726_s22  ;;  %p2074_p7 = scmp.ge.s32.totalorder %s2594_s16, 1 }
  0x16   : > { %s3224_s23 = scalar_select %p2728_p5, 1, 0 }
  0x17   : > { %s3225_s24 = scalar_select %p2732_p6, 1, 0 }
  0x18   : > { %p369_p8 = scmp.lt.s32.totalorder %s2594_s16, 3  ;;  %p3212_p9 = scmp.eq.s32.totalorder %s2711_s17, 0 }
  0x19   : > { %3226 = sst [smem:[#allocation23_spill]] %s3225_s24  ;;  %s2596_s26 = smov [#allocation5]  }
  0x1a   : > { %p2739_p10 = pnand %p2074_p7, %p369_p8  ;;  %s405_s27 = sshll.u32 %s2596_s26, 4  ;;  %s406_s27 = int_to_ptr.vmem [resolvable:$true] %s405_s27 }
  0x1b   : > { %s2597_s28 = smov [#allocation2]   ;;  %s2598_s21 = smov [#allocation7]  }
  0x1c   : > { %s3227_s25 = scalar_select %p2739_p10, 1, 0 }
  0x1d   : > { %p2268_p11 = pneg %p2739_p10  ;;  %s391_s18 = sshll.u32 %s2597_s28, 4  ;;  %s2751_s18 = int_to_ptr.vmem [resolvable:$true] %s391_s18 }
  0x1e   : > { %s416_s22 = sshll.u32 %s2598_s21, 4  ;;  %s2376_s26 = scalar_lea.hbm %s3197_s6, 16  ;;  %s2753_s22 = int_to_ptr.vmem [resolvable:$true] %s416_s22 }
  0x1f   : > { %p2747_p12 = pnand %p3212_p9, %p2268_p11  ;;  %p2377_p13 = scmp.ne.s32.totalorder %s3197_s6, %s2376_s26 }
  0x20   : > { %p2383_p3 = scmp.lt.u32.totalorder %s2376_s26, %s3197_s6 }
  0x21   : > { %p2763_p0 = pneg %p2747_p12 }
  0x23   : > { %p2379_p1 = pnand %p2763_p0, %p2377_p13 }
  0x25   : > { %p2380_p2 = pneg %p2379_p1 }
  0x27   : > { %p2385_p4 = pnand %p2383_p3, %p2380_p2 }
  0x29   : > { %2388 = shalt.err (!%p2385_p4)
}
  0x2a   : > { %s2389_s15 = scalar_lea.vmem %s406_s27, 16  ;;  %s2396_s29 = scalar_lea.vmem %s406_s27, 32 }
  0x2b   : > { %p2390_p7 = scmp.ne.s32.totalorder %s406_s27, %s2389_s15  ;;  %p2397_p9 = scmp.lt.s32.totalorder %s406_s27, %s406_s27 }
  0x2c   : > { %p2398_p6 = scmp.lt.s32.totalorder %s2396_s29, %s2389_s15 }
  0x2d   : > { %p2392_p8 = pnand %p2390_p7, %p2763_p0 }
  0x2e   : > { %p2399_p5 = por %p2398_p6, %p2397_p9 }
  0x2f   : > { %p2393_p11 = pneg %p2392_p8 }
  0x31   : > { %p2400_p10 = pnand %p2399_p5, %p2393_p11 }
  0x33   : > { %2403 = shalt.err (!%p2400_p10)
}
  0x34   : > { %2274 = dma.hbm_to_vmem [thread:$0]  (!%p2747_p12), %s3197_s6, 16, %s406_s27, [#allocation6]  }
  0x35   : > { %s2404_s21 = scalar_lea.hbm %s3195_s4, 16 }
  0x36   : > { %p2405_p13 = scmp.ne.s32.totalorder %s3195_s4, %s2404_s21  ;;  %p2411_p5 = scmp.lt.u32.totalorder %s2404_s21, %s3195_s4 }
  0x38   : > { %p2407_p1 = pnand %p2405_p13, %p2763_p0 }
  0x3a   : > { %p2408_p6 = pneg %p2407_p1 }
  0x3c   : > { %p2413_p9 = pnand %p2411_p5, %p2408_p6 }
  0x3e   : > { %2416 = shalt.err (!%p2413_p9)
}
  0x3f   : > { %s2417_s27 = scalar_lea.vmem %s2751_s18, 16  ;;  %s2424_s12 = scalar_lea.vmem %s2751_s18, 32 }
  0x40   : > { %p2418_p10 = scmp.ne.s32.totalorder %s2751_s18, %s2417_s27  ;;  %p2425_p4 = scmp.lt.s32.totalorder %s2751_s18, %s2751_s18 }
  0x41   : > { %p2426_p7 = scmp.lt.s32.totalorder %s2424_s12, %s2417_s27 }
  0x42   : > { %p2420_p2 = pnand %p2418_p10, %p2763_p0 }
  0x43   : > { %p2427_p8 = por %p2426_p7, %p2425_p4 }
  0x44   : > { %p2421_p3 = pneg %p2420_p2 }
  0x46   : > { %p2428_p11 = pnand %p2427_p8, %p2421_p3 }
  0x48   : > { %2431 = shalt.err (!%p2428_p11)
}
  0x49   : > { %2271 = dma.hbm_to_vmem [thread:$0]  (!%p2747_p12), %s3195_s4, 16, %s2751_s18, [#allocation3]  }
  0x4a   : > { %s2432_s26 = scalar_lea.hbm %s3198_s7, 16 }
  0x4b   : > { %p2433_p13 = scmp.ne.s32.totalorder %s3198_s7, %s2432_s26  ;;  %p2439_p5 = scmp.lt.u32.totalorder %s2432_s26, %s3198_s7 }
  0x4d   : > { %p2435_p1 = pnand %p2433_p13, %p2763_p0 }
  0x4f   : > { %p2436_p6 = pneg %p2435_p1 }
  0x51   : > { %p2441_p9 = pnand %p2439_p5, %p2436_p6 }
  0x53   : > { %2444 = shalt.err (!%p2441_p9)
}
  0x54   : > { %s2445_s18 = scalar_lea.vmem %s2753_s22, 16  ;;  %s2452_s12 = scalar_lea.vmem %s2753_s22, 32 }
  0x55   : > { %p2446_p10 = scmp.ne.s32.totalorder %s2753_s22, %s2445_s18  ;;  %p2453_p4 = scmp.lt.s32.totalorder %s2753_s22, %s2753_s22 }
  0x56   : > { %p2454_p7 = scmp.lt.s32.totalorder %s2452_s12, %s2445_s18 }
  0x57   : > { %p2448_p2 = pnand %p2446_p10, %p2763_p0 }
  0x58   : > { %p2455_p8 = por %p2454_p7, %p2453_p4 }
  0x59   : > { %p2449_p3 = pneg %p2448_p2 }
  0x5b   : > { %p2456_p11 = pnand %p2455_p8, %p2449_p3 }
  0x5d   : > { %2459 = shalt.err (!%p2456_p11)
}
  0x5e   : > { %2277 = dma.hbm_to_vmem [thread:$0]  (!%p2747_p12), %s3198_s7, 16, %s2753_s22, [#allocation6]  }
  0x5f   : > { %s2599_s24 = smov [#allocation8]   ;;  %s2460_s15 = scalar_lea.hbm %s3199_s8, 16 }
  0x60   : > { %s427_s16 = sshll.u32 %s2599_s24, 4  ;;  %p2461_p13 = scmp.ne.s32.totalorder %s3199_s8, %s2460_s15  ;;  %s428_s16 = int_to_ptr.vmem [resolvable:$true] %s427_s16 }
  0x61   : > { %p2467_p5 = scmp.lt.u32.totalorder %s2460_s15, %s3199_s8 }
  0x62   : > { %p2463_p1 = pnand %p2461_p13, %p2763_p0 }
  0x64   : > { %p2464_p6 = pneg %p2463_p1 }
  0x66   : > { %p2469_p9 = pnand %p2467_p5, %p2464_p6 }
  0x68   : > { %2472 = shalt.err (!%p2469_p9)
}
  0x69   : > { %s2473_s22 = scalar_lea.vmem %s428_s16, 16  ;;  %s2480_s13 = scalar_lea.vmem %s428_s16, 32 }
  0x6a   : > { %p2474_p10 = scmp.ne.s32.totalorder %s428_s16, %s2473_s22  ;;  %p2481_p4 = scmp.lt.s32.totalorder %s428_s16, %s428_s16 }
  0x6b   : > { %p2482_p7 = scmp.lt.s32.totalorder %s2480_s13, %s2473_s22 }
  0x6c   : > { %p2476_p2 = pnand %p2474_p10, %p2763_p0 }
  0x6d   : > { %p2483_p8 = por %p2482_p7, %p2481_p4 }
  0x6e   : > { %p2477_p3 = pneg %p2476_p2 }
  0x70   : > { %p2484_p11 = pnand %p2483_p8, %p2477_p3 }
  0x72   : > { %2487 = shalt.err (!%p2484_p11)
}
  0x73   : > { %2280 = dma.hbm_to_vmem [thread:$0]  (!%p2747_p12), %s3199_s8, 16, %s428_s16, [#allocation9]  }
  0x74   : > { %p3230_p13 = scmp.ne.s32.totalorder %s3227_s25, 0 }
  0x75   : > { %p3231_p1 = scmp.eq.s32.totalorder (!%p3230_p13), %s2711_s17, 0 }
  0x76   : > { %459 = sbr.rel (%p3230_p13) target bundleno = 2852 (0xb24), region = 72 }
  0x7d   : > { %2561 = dma.done.wait (%p3231_p1), [#allocation3], 16   ;;  %p3232_p0 = pmov %p3231_p1 }
  0x7f   : > { %2563 = vsyncadd (%p3232_p0), [#allocation3], 4294967280  ;;  %p3233_p6 = pmov %p3232_p0 }
  0x80   : > { %p3234_p5 = pmov %p3232_p0 }
  0x81   : > { %2565 = dma.done.wait (%p3233_p6), [#allocation6], 32  }
  0x82   : > { %2567 = vsyncadd (%p3234_p5), [#allocation6], 4294967264  ;;  %p3235_p9 = pmov %p3232_p0 }
  0x83   : > { %p3236_p12 = pmov %p3232_p0 }
  0x84   : > { %2569 = dma.done.wait (%p3235_p9), [#allocation9], 16  }
  0x85   : > { %2571 = vsyncadd (%p3236_p12), [#allocation9], 4294967280  ;;  %p521_p10 = scmp.lt.s32.totalorder %s2711_s17, 1  ;;  %s3237_s0 = sld [smem:[#allocation24_spill]]  ;;  %vm529_vm0 = vcmask 261120   ;;  %v2346_v7 = vld [vmem:[%s3194_s3] sm:$0xff]   ;;  %v640_v31 = vlaneseq }
  0x86   : > { %v2600_v8 = vmov 0.0   ;;  %vm2601_vm1 = vmmov 0   ;;  %v2347_v9 = vld [vmem:[%s3194_s3 + $0x8] sm:$0xff]   ;;  %v2088_v14 = vld [vmem:[%s3192_s1] ss:$0 sm:$0xff]  ;;  %s2602_s19 = smov 104  }
  0x87   : > { %s522_s25 = scalar_select %p521_p10, %s2711_s17, 1  ;;  %2164 = vmatprep.subr.bf16.mxu0 %v2600_v8  ;;  %2168 = vmatprep.mubr.msk.bf16.mxu0 %vm2601_vm1, %v2600_v8  ;;  %v2089_v16 = vld [vmem:[%s3193_s2] ss:$0 sm:$0xff]  ;;  %v2606_v29 = vmov 1983009808   ;;  %v641_v33 = vshrl.u32 %v640_v31, 7 }
  0x88   : > { %2165 = vmatpush3.bf16.msra.mxu0 %v2346_v7  ;;  %2172 = vmatprep.subr.bf16.mxu1 %v2600_v8  ;;  %v2090_v20 = vld [vmem:[#allocation2] ss:$0 sm:$0xff]  ;;  %s2603_s24 = smov 120   ;;  %v638_v30 = vunpack.c.l.s4 %v2606_v29  ;;  %v2607_v35 = vmov 1934713408   ;;  %vm1079_vm2 = vcmask 64512  }
  0x89   : > { %s2087_s20 = sshll.u32 %s522_s25, 3  ;;  %2166 = vmatprep.subr.bf16.mxu0 %v2600_v8  ;;  %2174 = vmatprep.mubr.msk.bf16.mxu1 %vm2601_vm1, %v2600_v8  ;;  %s2604_s25 = smov 112   ;;  %v670_v36 = vunpack.c.l.s4 %v2607_v35  ;;  %vm1312_vm3 = vcmask 60416   ;;  %vm1320_vm4 = vcmask 1043456   ;;  %vm1651_vm5 = vcmask 130048  }
  0x8a   : > { %v639_v32 = vunpack.c.0.s8 %v638_v30  ;;  %s2608_s28 = smov 64   ;;  %s2995_s16 = sand.u32 1, %s2586_s30   ;;  %vm1653_vm6 = vcmask 195584   ;;  %vm1860_vm7 = vcmask 523264  }
  0x8b   : > { %s524_s26 = scalar_lea.vmem %s3237_s0, %s2087_s20  ;;  %s2605_s20 = smov 96   ;;  %v671_v43 = vunpack.c.0.s8 %v670_v36 }
  0x8c   : > { %v2864_v0 = vld [vmem:[%s524_s26] sm:$0xff]  ;;  %2167 = vmatpush3.bf16.msra.mxu0 %v2347_v9  ;;  %v2912_v39 = vsub.s32 %v639_v32, %v641_v33  ;;  %s2086_s26 = sshll.u32 %s2995_s16, 4  ;;  %s2609_s12 = smov 16  }
  0x8d   : > { %v530_v1 = vsel %vm529_vm0, %v2864_v0, 0.0  ;;  %2178 = vmatprep.subr.bf16.mxu0 %v2600_v8  ;;  %v2922_v49 = vsub.s32 %v671_v43, %v641_v33  ;;  %s3006_s21 = scalar_lea.vmem [#allocation11], %s2086_s26  ;;  %s2610_s22 = smov 8  }
  0x8e   : > { %531 = vadd.xlane.f32.xlu0 %v530_v1  ;;  %s2611_s13 = smov 24   ;;  %s1912_s27 = scalar_lea.sflag [#allocation12], %s2995_s16 }
  0x8f   : > { %p3238_p3 = scmp.ne.s32.totalorder %s3224_s23, 0 }
 0x11b   : > { %v532_v2 = vpop.xlane.xlu0 %531 }
 0x11c   : > { %v534_v3 = vmul.f32 0.03125, %v532_v2 }
 0x11e   : > { %v535_v4 = vsub.f32 %v2864_v0, %v534_v3 }
 0x120   : > { %v536_v5 = vmul.f32 %v535_v4, %v535_v4 }
 0x122   : > { %v537_v6 = vsel %vm529_vm0, %v536_v5, 0.0 }
 0x123   : > { %538 = vadd.xlane.f32.xlu0 %v537_v6 }
 0x1b0   : > { %v539_v10 = vpop.xlane.xlu0 %538 }
 0x1b1   : > { %v540_v11 = vmul.f32 0.03125, %v539_v10 }
 0x1b3   : > { %v541_v12 = vadd.f32 1e-05, %v540_v11 }
 0x1b5   : > { %2356 = vrsqrt.f32 %v541_v12 }
 0x1bf   : > { %v2357_v13 = vpop.eup %2356 }
 0x1c0   : > { %v543_v15 = vmul.f32 %v2357_v13, %v535_v4 }
 0x1c2   : > { %v550_v17 = vmul.f32 %v2088_v14, %v543_v15 }
 0x1c4   : > { %v557_v18 = vadd.f32 %v2089_v16, %v550_v17 }
 0x1c6   : > { %v558_v19 = vpack.c.bf16 %v557_v18, %v557_v18 }
 0x1c8   : > { %2169 = vmatmul.mubr.msk.bf16.vlgmr.msra.gmra.mrb[0].mxu0 %vm529_vm0, %v558_v19 }
 0x1c9   : > { %2180 = vmatprep.mubr.msk.bf16.mxu0 %vm2601_vm1, %v2600_v8 }
 0x29b   : > { %v619_v21 = vpop.f32.mrb[0].mxu0 }
 0x29c   : > { %v2893_v22 = vadd.f32 %v2090_v20, %v619_v21  ;;  %v2170_v23 = vpop.f32.mrb[1].mxu0 }
 0x29d   : > { %v622_v24 = vpop.f32.mrb[2].mxu0 }
 0x29e   : > { %632 = vrot.lane.b32.xlu0 %v2893_v22, %s2602_s19  ;;  %626 = vrot.lane.b32.xlu1 %v2893_v22, %s2603_s24  ;;  %v2171_v25 = vpop.f32.mrb[3].mxu0 }
 0x2a2   : > { %629 = vrot.lane.b32.xlu1 %v2893_v22, %s2604_s25  ;;  %s1938_s25 = sshll.u32 %s3006_s21, 4  ;;  %s3105_s25 = int_to_ptr.vmem [resolvable:$true] %s1938_s25 }
 0x2a3   : > { %s2488_s18 = scalar_lea.vmem %s3105_s25, 256 }
 0x2a4   : > { %p2489_p2 = scmp.ne.s32.totalorder %s3105_s25, %s2488_s18 }
 0x2a6   : > { %775 = vrot.lane.b32.xlu1 %v2893_v22, %s2605_s20  ;;  %p2490_p4 = pnand %p2489_p2, %p3238_p3 }
 0x2a8   : > { %p2491_p7 = pneg %p2490_p4 }
 0x310   : > { %v2899_v26 = vpop.permute.xlu1 %626  ;;  %v2905_v28 = vpop.permute.xlu0 %632 }
 0x311   : > { %777 = vrot.lane.b32.xlu1 %v2899_v26, %s2605_s20  ;;  %v651_v40 = vcombine.low %v2899_v26, %v2905_v28  ;;  %v652_v41 = vcombine.high %v2899_v26, %v2905_v28 }
 0x313   : > { %v659_v46 = vrot.slane %v651_v40, %v2912_v39  ;;  %v666_v47 = vrot.slane %v652_v41, %v2912_v39 }
 0x314   : > { %v2902_v27 = vpop.permute.xlu1 %629 }
 0x315   : > { %779 = vrot.lane.b32.xlu1 %v2902_v27, %s2605_s20  ;;  %v635_v37 = vcombine.low %v2893_v22, %v2902_v27  ;;  %v636_v38 = vcombine.high %v2893_v22, %v2902_v27 }
 0x317   : > { %v643_v44 = vrot.slane %v635_v37, %v2912_v39  ;;  %v650_v45 = vrot.slane %v636_v38, %v2912_v39 }
 0x318   : > { %v776_v34 = vpop.permute.xlu1 %775 }
 0x319   : > { %781 = vrot.lane.b32.xlu1 %v2905_v28, %s2605_s20  ;;  %v667_v50 = vcombine.low %v643_v44, %v659_v46  ;;  %v668_v51 = vcombine.high %v643_v44, %v659_v46  ;;  %v683_v52 = vcombine.low %v650_v45, %v666_v47  ;;  %v684_v53 = vcombine.high %v650_v45, %v666_v47  ;;  %s2133_s20 = sshll.u32 %s2711_s17, 8 }
 0x31a   : > { %s3110_s29 = scalar_lea.hbm %s3205_s14, %s2133_s20 }
 0x31b   : > { %v675_v59 = vrot.slane %v667_v50, %v2922_v49  ;;  %v682_v60 = vrot.slane %v668_v51, %v2922_v49  ;;  %v691_v61 = vrot.slane %v683_v52, %v2922_v49  ;;  %v698_v62 = vrot.slane %v684_v53, %v2922_v49 }
 0x31d   : > { %v703_v9 = vcombine.low %v675_v59, %v682_v60  ;;  %v2094_v10 = vcombine.high %v675_v59, %v682_v60  ;;  %v719_v11 = vcombine.low %v691_v61, %v698_v62  ;;  %v2095_v12 = vcombine.high %v691_v61, %v698_v62 }
 0x31f   : > { %v710_v21 = vrot.slane %v703_v9, %v2912_v39  ;;  %v718_v23 = vrot.slane %v2094_v10, %v2912_v39  ;;  %v726_v24 = vrot.slane %v719_v11, %v2912_v39  ;;  %v734_v25 = vrot.slane %v2095_v12, %v2912_v39 }
 0x321   : > { %v735_v40 = vcombine.low %v710_v21, %v718_v23  ;;  %v751_v41 = vcombine.low %v726_v24, %v734_v25 }
 0x323   : > { %v759_v50 = vrot.slane %v751_v41, %v2922_v49 }
 0x383   : > { %v778_v42 = vpop.permute.xlu1 %777 }
 0x387   : > { %v780_v48 = vpop.permute.xlu1 %779 }
 0x388   : > { %v787_v54 = vcombine.low %v776_v34, %v780_v48  ;;  %v788_v55 = vcombine.high %v776_v34, %v780_v48  ;;  %v743_v48 = vrot.slane %v735_v40, %v2922_v49 }
 0x38a   : > { %v795_v63 = vrot.slane %v787_v54, %v2912_v39  ;;  %v802_v1 = vrot.slane %v788_v55, %v2912_v39  ;;  %v736_v55 = vcombine.high %v710_v21, %v718_v23 }
 0x38b   : > { %v782_v56 = vpop.permute.xlu1 %781 }
 0x38c   : > { %v803_v57 = vcombine.low %v778_v42, %v782_v56  ;;  %v804_v58 = vcombine.high %v778_v42, %v782_v56  ;;  %v752_v56 = vcombine.high %v726_v24, %v734_v25 }
 0x38e   : > { %v811_v2 = vrot.slane %v803_v57, %v2912_v39  ;;  %v818_v3 = vrot.slane %v804_v58, %v2912_v39  ;;  %v767_v57 = vcombine.low %v743_v48, %v759_v50  ;;  %v768_v58 = vcombine.high %v743_v48, %v759_v50 }
 0x390   : > { %v819_v4 = vcombine.low %v795_v63, %v811_v2  ;;  %v820_v5 = vcombine.high %v795_v63, %v811_v2  ;;  %v835_v6 = vcombine.low %v802_v1, %v818_v3  ;;  %v836_v7 = vcombine.high %v802_v1, %v818_v3 }
 0x391   : > { %v771_v61 = vpack.c.bf16 %v767_v57, %v767_v57  ;;  %v772_v62 = vpack.c.bf16 %v768_v58, %v768_v58  ;;  %v750_v63 = vrot.slane %v736_v55, %v2922_v49  ;;  %v766_v1 = vrot.slane %v752_v56, %v2922_v49 }
 0x392   : > { %v827_v13 = vrot.slane %v819_v4, %v2922_v49  ;;  %v834_v14 = vrot.slane %v820_v5, %v2922_v49  ;;  %v843_v15 = vrot.slane %v835_v6, %v2922_v49  ;;  %v850_v16 = vrot.slane %v836_v7, %v2922_v49 }
 0x393   : > { %v769_v4 = vcombine.low %v750_v63, %v766_v1  ;;  %v770_v5 = vcombine.high %v750_v63, %v766_v1 }
 0x394   : > { %v855_v17 = vcombine.low %v827_v13, %v834_v14  ;;  %v2096_v18 = vcombine.high %v827_v13, %v834_v14  ;;  %v871_v19 = vcombine.low %v843_v15, %v850_v16  ;;  %v2097_v20 = vcombine.high %v843_v15, %v850_v16 }
 0x395   : > { %v773_v6 = vpack.c.bf16 %v769_v4, %v769_v4  ;;  %v774_v7 = vpack.c.bf16 %v770_v5, %v770_v5 }
 0x396   : > { %v862_v29 = vrot.slane %v855_v17, %v2912_v39  ;;  %v870_v30 = vrot.slane %v2096_v18, %v2912_v39  ;;  %v878_v31 = vrot.slane %v871_v19, %v2912_v39  ;;  %v886_v32 = vrot.slane %v2097_v20, %v2912_v39 }
 0x398   : > { %v887_v33 = vcombine.low %v862_v29, %v870_v30  ;;  %v903_v34 = vcombine.low %v878_v31, %v886_v32  ;;  %v888_v35 = vcombine.high %v862_v29, %v870_v30  ;;  %v904_v36 = vcombine.high %v878_v31, %v886_v32 }
 0x39a   : > { %v895_v37 = vrot.slane %v887_v33, %v2922_v49  ;;  %v911_v38 = vrot.slane %v903_v34, %v2922_v49  ;;  %v902_v44 = vrot.slane %v888_v35, %v2922_v49  ;;  %v918_v45 = vrot.slane %v904_v36, %v2922_v49 }
 0x39c   : > { %v919_v42 = vcombine.low %v895_v37, %v911_v38  ;;  %v920_v43 = vcombine.high %v895_v37, %v911_v38  ;;  %v921_v53 = vcombine.low %v902_v44, %v918_v45  ;;  %v922_v54 = vcombine.high %v902_v44, %v918_v45 }
 0x39e   : > { %v923_v46 = vpack.c.bf16 %v919_v42, %v919_v42  ;;  %v924_v47 = vpack.c.bf16 %v920_v43, %v920_v43  ;;  %v925_v59 = vpack.c.bf16 %v921_v53, %v921_v53  ;;  %v926_v60 = vpack.c.bf16 %v922_v54, %v922_v54 }
 0x3a0   : > { %v1084_v51 = vsel %vm1079_vm2, %v923_v46, 0  ;;  %v1130_v52 = vsel %vm1079_vm2, %v924_v47, 0  ;;  %v1176_v2 = vsel %vm1079_vm2, %v925_v59, 0  ;;  %v1222_v3 = vsel %vm1079_vm2, %v926_v60, 0 }
 0x3a1   : > { %2173 = vmatpush3.bf16.xpose.msra.mxu1 %v1084_v51  ;;  %2179 = vmatpush3.bf16.xpose.msra.mxu0 %v1130_v52 }
 0x3a2   : > { %2184 = vmatprep.subr.bf16.mxu1 %v2600_v8  ;;  %2190 = vmatprep.subr.bf16.mxu0 %v2600_v8 }
 0x3a8   : > { %2175 = vmatmul.mubr.msk.bf16.vlgmr.msra.gmra.mrb[0].mxu1 %vm1079_vm2, %v771_v61  ;;  %2181 = vmatmul.mubr.msk.bf16.vlgmr.msra.gmra.mrb[4].mxu0 %vm1079_vm2, %v772_v62 }
 0x3a9   : > { %2185 = vmatpush3.bf16.xpose.msra.mxu1 %v1176_v2  ;;  %2191 = vmatpush3.bf16.xpose.msra.mxu0 %v1222_v3 }
 0x3aa   : > { %2186 = vmatprep.mubr.msk.bf16.mxu1 %vm2601_vm1, %v2600_v8  ;;  %2192 = vmatprep.mubr.msk.bf16.mxu0 %vm2601_vm1, %v2600_v8 }
 0x3ab   : > { %2196 = vmatprep.subr.bf16.mxu1 %v2600_v8  ;;  %2202 = vmatprep.subr.bf16.mxu0 %v2600_v8 }
 0x3b0   : > { %2187 = vmatmul.mubr.msk.bf16.vlgmr.msra.gmra.mrb[4].mxu1 %vm1079_vm2, %v773_v6  ;;  %2193 = vmatmul.mubr.msk.bf16.vlgmr.msra.gmra.mrb[8].mxu0 %vm1079_vm2, %v774_v7 }
 0x3b1   : > { %2198 = vmatprep.mubr.msk.bf16.mxu1 %vm2601_vm1, %v2600_v8  ;;  %2204 = vmatprep.mubr.msk.bf16.mxu0 %vm2601_vm1, %v2600_v8 }
 0x47b   : > { %v1120_v9 = vpop.f32.mrb[0].mxu1  ;;  %v1166_v10 = vpop.f32.mrb[4].mxu0 }
 0x47c   : > { %v2176_v11 = vpop.f32.mrb[1].mxu1  ;;  %v2182_v12 = vpop.f32.mrb[5].mxu0  ;;  %v1264_v13 = vsel %vm1079_vm2, %v1120_v9, -inf  ;;  %v1267_v14 = vsel %vm1079_vm2, %v1166_v10, -inf }
 0x47d   : > { %1265 = vmax.xlane.f32.xlu1 %v1264_v13  ;;  %v1123_v15 = vpop.f32.mrb[2].mxu1  ;;  %1268 = vmax.xlane.f32.xlu0 %v1267_v14  ;;  %v1169_v16 = vpop.f32.mrb[6].mxu0 }
 0x47e   : > { %v2177_v17 = vpop.f32.mrb[3].mxu1  ;;  %v2183_v18 = vpop.f32.mrb[7].mxu0 }
 0x483   : > { %v1212_v19 = vpop.f32.mrb[4].mxu1  ;;  %v1258_v20 = vpop.f32.mrb[8].mxu0 }
 0x484   : > { %v2188_v21 = vpop.f32.mrb[5].mxu1  ;;  %v2194_v23 = vpop.f32.mrb[9].mxu0  ;;  %v1270_v24 = vsel %vm1079_vm2, %v1212_v19, -inf  ;;  %v1273_v25 = vsel %vm1079_vm2, %v1258_v20, -inf }
 0x485   : > { %1271 = vmax.xlane.f32.xlu1 %v1270_v24  ;;  %v1215_v29 = vpop.f32.mrb[6].mxu1  ;;  %1274 = vmax.xlane.f32.xlu0 %v1273_v25  ;;  %v1261_v30 = vpop.f32.mrb[10].mxu0 }
 0x486   : > { %v2189_v31 = vpop.f32.mrb[7].mxu1  ;;  %v2195_v32 = vpop.f32.mrb[11].mxu0 }
 0x496   : > { %927 = vrot.lane.b32.xlu1 %v2893_v22, %s2608_s28 }
 0x50a   : > { %v1266_v33 = vpop.xlane.xlu1 %1265  ;;  %v1269_v34 = vpop.xlane.xlu0 %1268 }
 0x50b   : > { %v1276_v35 = vsub.f32 %v1120_v9, %v1266_v33  ;;  %v1277_v36 = vsub.f32 %v1166_v10, %v1269_v34 }
 0x50d   : > { %v1280_v37 = vmul.f32 1.442695, %v1276_v35  ;;  %v1282_v38 = vmul.f32 1.442695, %v1277_v36 }
 0x50f   : > { %2358 = vpow2.f32 %v1280_v37 }
 0x510   : > { %2360 = vpow2.f32 %v1282_v38 }
 0x512   : > { %v1272_v22 = vpop.xlane.xlu1 %1271  ;;  %v1275_v45 = vpop.xlane.xlu0 %1274 }
 0x513   : > { %v1278_v44 = vsub.f32 %v1212_v19, %v1272_v22  ;;  %v1279_v46 = vsub.f32 %v1258_v20, %v1275_v45 }
 0x515   : > { %v1284_v47 = vmul.f32 1.442695, %v1278_v44  ;;  %v1286_v48 = vmul.f32 1.442695, %v1279_v46 }
 0x517   : > { %2362 = vpow2.f32 %v1284_v47 }
 0x518   : > { %2364 = vpow2.f32 %v1286_v48 }
 0x519   : > { %v2359_v40 = vpop.eup %2358 }
 0x51a   : > { %v2361_v41 = vpop.eup %2360  ;;  %v1288_v42 = vsel %vm1079_vm2, %v2359_v40, 0.0 }
 0x51b   : > { %1289 = vadd.xlane.f32.xlu1 %v1288_v42  ;;  %v1291_v43 = vsel %vm1079_vm2, %v2361_v41, 0.0 }
 0x51c   : > { %1292 = vadd.xlane.f32.xlu0 %v1291_v43 }
 0x521   : > { %v2986_v50 = vpop.eup %2362 }
 0x522   : > { %v2988_v51 = vpop.eup %2364 }
 0x52c   : > { %931 = vrot.lane.b32.xlu1 %v2902_v27, %s2608_s28  ;;  %v1294_v27 = vsel %vm1079_vm2, %v2986_v50, 0.0 }
 0x530   : > { %933 = vrot.lane.b32.xlu1 %v2905_v28, %s2608_s28  ;;  %v928_v28 = vpop.permute.xlu1 %927 }
 0x532   : > { %929 = vrot.lane.b32.xlu0 %v2899_v26, %s2608_s28  ;;  %v1297_v26 = vsel %vm1079_vm2, %v2988_v51, 0.0 }
 0x551   : > { %1295 = vadd.xlane.f32.xlu0 %v1294_v27 }
 0x554   : > { %1298 = vadd.xlane.f32.xlu1 %v1297_v26 }
 0x5a8   : > { %v1290_v52 = vpop.xlane.xlu1 %1289 }
 0x5a9   : > { %2366 = vrcp.f32 %v1290_v52  ;;  %v1293_v53 = vpop.xlane.xlu0 %1292 }
 0x5aa   : > { %2368 = vrcp.f32 %v1293_v53 }
 0x5ac   : > { %v932_v54 = vpop.permute.xlu1 %931 }
 0x5ad   : > { %v939_v55 = vcombine.low %v928_v28, %v932_v54  ;;  %v940_v56 = vcombine.high %v928_v28, %v932_v54  ;;  %v930_v57 = vpop.permute.xlu0 %929 }
 0x5af   : > { %v947_v62 = vrot.slane %v939_v55, %v2912_v39  ;;  %v954_v63 = vrot.slane %v940_v56, %v2912_v39 }
 0x5b0   : > { %v934_v58 = vpop.permute.xlu1 %933 }
 0x5b1   : > { %v955_v59 = vcombine.low %v930_v57, %v934_v58  ;;  %v956_v60 = vcombine.high %v930_v57, %v934_v58 }
 0x5b3   : > { %v2367_v61 = vpop.eup %2366  ;;  %v963_v1 = vrot.slane %v955_v59, %v2912_v39  ;;  %v970_v2 = vrot.slane %v956_v60, %v2912_v39 }
 0x5b4   : > { %v2369_v3 = vpop.eup %2368  ;;  %v1304_v4 = vmul.f32 %v2367_v61, %v2359_v40 }
 0x5b5   : > { %v1305_v5 = vmul.f32 %v2369_v3, %v2361_v41  ;;  %v971_v6 = vcombine.low %v947_v62, %v963_v1  ;;  %v972_v7 = vcombine.high %v947_v62, %v963_v1  ;;  %v987_v9 = vcombine.low %v954_v63, %v970_v2 }
 0x5b6   : > { %v988_v10 = vcombine.high %v954_v63, %v970_v2  ;;  %v1308_v11 = vpack.c.bf16 %v1304_v4, %v1304_v4 }
 0x5b7   : > { %v979_v12 = vrot.slane %v971_v6, %v2922_v49  ;;  %v986_v13 = vrot.slane %v972_v7, %v2922_v49  ;;  %v995_v14 = vrot.slane %v987_v9, %v2922_v49  ;;  %v1309_v15 = vpack.c.bf16 %v1305_v5, %v1305_v5 }
 0x5b8   : > { %v1002_v16 = vrot.slane %v988_v10, %v2922_v49  ;;  %1313 = vst.msk [vmem:[%s3006_s21] sm:$0xf] %vm1312_vm3, %v1308_v11 }
 0x5b9   : > { %v1007_v17 = vcombine.low %v979_v12, %v986_v13  ;;  %v2098_v18 = vcombine.high %v979_v12, %v986_v13  ;;  %1314 = vst.msk [vmem:[%s3006_s21 + $0x4] sm:$0xf] %vm1312_vm3, %v1309_v15 }
 0x5ba   : > { %v1023_v19 = vcombine.low %v995_v14, %v1002_v16  ;;  %v2099_v20 = vcombine.high %v995_v14, %v1002_v16 }
 0x5bb   : > { %v1014_v21 = vrot.slane %v1007_v17, %v2912_v39  ;;  %v1022_v23 = vrot.slane %v2098_v18, %v2912_v39 }
 0x5bc   : > { %v1030_v24 = vrot.slane %v1023_v19, %v2912_v39  ;;  %v1038_v25 = vrot.slane %v2099_v20, %v2912_v39 }
 0x5bd   : > { %v1039_v29 = vcombine.low %v1014_v21, %v1022_v23  ;;  %v1040_v30 = vcombine.high %v1014_v21, %v1022_v23  ;;  %v2349_v23 = vld [vmem:[%s3196_s5 + $0x8] sm:$0xff]  }
 0x5be   : > { %v1055_v31 = vcombine.low %v1030_v24, %v1038_v25  ;;  %v1056_v32 = vcombine.high %v1030_v24, %v1038_v25 }
 0x5bf   : > { %v1047_v33 = vrot.slane %v1039_v29, %v2922_v49  ;;  %v1054_v34 = vrot.slane %v1040_v30, %v2922_v49 }
 0x5c0   : > { %v1063_v35 = vrot.slane %v1055_v31, %v2922_v49  ;;  %v1070_v36 = vrot.slane %v1056_v32, %v2922_v49 }
 0x5c2   : > { %v1071_v37 = vcombine.low %v1047_v33, %v1063_v35  ;;  %v1072_v38 = vcombine.high %v1047_v33, %v1063_v35  ;;  %v1073_v40 = vcombine.low %v1054_v34, %v1070_v36  ;;  %v1074_v41 = vcombine.high %v1054_v34, %v1070_v36 }
 0x5c4   : > { %v1075_v42 = vpack.c.bf16 %v1071_v37, %v1071_v37  ;;  %v1076_v43 = vpack.c.bf16 %v1072_v38, %v1072_v38  ;;  %v1077_v45 = vpack.c.bf16 %v1073_v40, %v1073_v40  ;;  %v1078_v46 = vpack.c.bf16 %v1074_v41, %v1074_v41 }
 0x5c6   : > { %v1322_v22 = vsel %vm1320_vm4, %v1075_v42, 0  ;;  %v1368_v44 = vsel %vm1320_vm4, %v1076_v43, 0  ;;  %v1414_v47 = vsel %vm1320_vm4, %v1077_v45, 0  ;;  %v1460_v48 = vsel %vm1320_vm4, %v1078_v46, 0 }
 0x5c7   : > { %2197 = vmatpush3.bf16.msra.mxu1 %v1322_v22  ;;  %2203 = vmatpush3.bf16.msra.mxu0 %v1368_v44 }
 0x5c8   : > { %2208 = vmatprep.subr.bf16.mxu1 %v2600_v8  ;;  %2214 = vmatprep.subr.bf16.mxu0 %v2600_v8 }
 0x5ca   : > { %2199 = vmatmul.mubr.msk.bf16.vlgmr.msra.gmra.mrb[8].mxu1 %vm1079_vm2, %v1308_v11  ;;  %2205 = vmatmul.mubr.msk.bf16.vlgmr.msra.gmra.mrb[12].mxu0 %vm1079_vm2, %v1309_v15 }
 0x5cb   : > { %2209 = vmatpush3.bf16.msra.mxu1 %v1414_v47  ;;  %2215 = vmatpush3.bf16.msra.mxu0 %v1460_v48 }
 0x5cc   : > { %2210 = vmatprep.mubr.msk.bf16.mxu1 %vm2601_vm1, %v2600_v8  ;;  %2216 = vmatprep.mubr.msk.bf16.mxu0 %vm2601_vm1, %v2600_v8 }
 0x5cd   : > { %2220 = vmatprep.subr.bf16.mxu1 %v2600_v8  ;;  %2228 = vmatprep.subr.bf16.mxu0 %v2600_v8 }
 0x5de   : > { %v1296_v27 = vpop.xlane.xlu0 %1295 }
 0x5df   : > { %2370 = vrcp.f32 %v1296_v27 }
 0x5e1   : > { %v1299_v26 = vpop.xlane.xlu1 %1298 }
 0x5e2   : > { %2372 = vrcp.f32 %v1299_v26 }
 0x5e9   : > { %v2371_v28 = vpop.eup %2370 }
 0x5ea   : > { %v1306_v52 = vmul.f32 %v2371_v28, %v2986_v50  ;;  %v2348_v50 = vld [vmem:[%s3196_s5] sm:$0xff]  }
 0x5ec   : > { %v2373_v53 = vpop.eup %2372  ;;  %v1310_v54 = vpack.c.bf16 %v1306_v52, %v1306_v52 }
 0x5ed   : > { %v1307_v55 = vmul.f32 %v2373_v53, %v2988_v51 }
 0x5ee   : > { %2211 = vmatmul.mubr.msk.bf16.vlgmr.msra.gmra.mrb[12].mxu1 %vm1079_vm2, %v1310_v54  ;;  %1315 = vst.msk [vmem:[%s3006_s21 + $0x8] sm:$0xf] %vm1312_vm3, %v1310_v54 }
 0x5ef   : > { %v1311_v56 = vpack.c.bf16 %v1307_v55, %v1307_v55  ;;  %2224 = vmatprep.mubr.msk.bf16.mxu1 %vm2601_vm1, %v2600_v8  ;;  %2221 = vmatpush3.bf16.msra.mxu1 %v2348_v50 }
 0x5f0   : > { %2222 = vmatprep.subr.bf16.mxu1 %v2600_v8 }
 0x5f1   : > { %2217 = vmatmul.mubr.msk.bf16.vlgmr.msra.gmra.mrb[16].mxu0 %vm1079_vm2, %v1311_v56  ;;  %1316 = vst.msk [vmem:[%s3006_s21 + $0xc] sm:$0xf] %vm1312_vm3, %v1311_v56  ;;  %v2110_v56 = vld [vmem:[#allocation5] ss:$0 sm:$0xff] }
 0x5f2   : > { %2232 = vmatprep.mubr.msk.bf16.mxu0 %vm2601_vm1, %v2600_v8 }
 0x5f3   : > { %2223 = vmatpush3.bf16.msra.mxu1 %v2349_v23 }
 0x5f4   : > { %2236 = vmatprep.subr.bf16.mxu1 %v2600_v8 }
 0x69d   : > { %v1358_v51 = vpop.f32.mrb[8].mxu1  ;;  %v1404_v57 = vpop.f32.mrb[12].mxu0 }
 0x69e   : > { %v2200_v58 = vpop.f32.mrb[9].mxu1  ;;  %v2206_v59 = vpop.f32.mrb[13].mxu0 }
 0x69f   : > { %v1361_v60 = vpop.f32.mrb[10].mxu1  ;;  %v1407_v61 = vpop.f32.mrb[14].mxu0 }
 0x6a0   : > { %v2201_v62 = vpop.f32.mrb[11].mxu1  ;;  %v2207_v63 = vpop.f32.mrb[15].mxu0 }
 0x6c1   : > { %v1450_v1 = vpop.f32.mrb[12].mxu1 }
 0x6c2   : > { %v1502_v2 = vcombine.low %v1358_v51, %v1450_v1  ;;  %v1503_v3 = vcombine.high %v1358_v51, %v1450_v1  ;;  %v2212_v4 = vpop.f32.mrb[13].mxu1 }
 0x6c3   : > { %v1453_v5 = vpop.f32.mrb[14].mxu1  ;;  %v2350_v4 = vld [vmem:[%s3200_s9] sm:$0xff]  }
 0x6c4   : > { %v2213_v6 = vpop.f32.mrb[15].mxu1  ;;  %v1496_v7 = vpop.f32.mrb[16].mxu0  ;;  %v1510_v13 = vrot.slane %v1502_v2, %v2912_v39  ;;  %v1517_v14 = vrot.slane %v1503_v3, %v2912_v39  ;;  %2229 = vmatpush3.bf16.msra.mxu0 %v2350_v4  ;;  %v2352_v5 = vld [vmem:[%s3202_s11] sm:$0xff]  }
 0x6c5   : > { %v1518_v9 = vcombine.low %v1404_v57, %v1496_v7  ;;  %v1519_v10 = vcombine.high %v1404_v57, %v1496_v7  ;;  %v2218_v11 = vpop.f32.mrb[17].mxu0  ;;  %2230 = vmatprep.subr.bf16.mxu0 %v2600_v8  ;;  %v2353_v6 = vld [vmem:[%s3202_s11 + $0x8] sm:$0xff]  }
 0x6c6   : > { %v1499_v12 = vpop.f32.mrb[18].mxu0 }
 0x6c7   : > { %v1526_v15 = vrot.slane %v1518_v9, %v2912_v39  ;;  %v1533_v16 = vrot.slane %v1519_v10, %v2912_v39  ;;  %v2219_v17 = vpop.f32.mrb[19].mxu0  ;;  %v2114_v12 = vld [vmem:[#allocation7] ss:$0 sm:$0xff] }
 0x6c9   : > { %v1534_v18 = vcombine.low %v1510_v13, %v1526_v15  ;;  %v1535_v19 = vcombine.high %v1510_v13, %v1526_v15  ;;  %v1550_v20 = vcombine.low %v1517_v14, %v1533_v16  ;;  %v1551_v21 = vcombine.high %v1517_v14, %v1533_v16  ;;  %v2115_v14 = vld [vmem:[#allocation8] ss:$0 sm:$0xff] }
 0x6cb   : > { %v1542_v24 = vrot.slane %v1534_v18, %v2922_v49  ;;  %v1549_v25 = vrot.slane %v1535_v19, %v2922_v49  ;;  %v1558_v29 = vrot.slane %v1550_v20, %v2922_v49  ;;  %v1565_v30 = vrot.slane %v1551_v21, %v2922_v49  ;;  %v2354_v18 = vld [vmem:[%s3202_s11 + $0x10] sm:$0xff]   ;;  %v2355_v19 = vld [vmem:[%s3202_s11 + $0x18] sm:$0xff]   ;;  %v2116_v20 = vld [vmem:[%s3201_s10] ss:$0 sm:$0xff] }
 0x6cd   : > { %v1570_v31 = vcombine.low %v1542_v24, %v1549_v25  ;;  %v2108_v32 = vcombine.high %v1542_v24, %v1549_v25  ;;  %v1586_v33 = vcombine.low %v1558_v29, %v1565_v30  ;;  %v2109_v34 = vcombine.high %v1558_v29, %v1565_v30 }
 0x6cf   : > { %v1577_v35 = vrot.slane %v1570_v31, %v2912_v39  ;;  %v1585_v36 = vrot.slane %v2108_v32, %v2912_v39  ;;  %v1593_v37 = vrot.slane %v1586_v33, %v2912_v39  ;;  %v1601_v38 = vrot.slane %v2109_v34, %v2912_v39 }
 0x6d1   : > { %v1603_v40 = vcombine.high %v1577_v35, %v1585_v36  ;;  %v1619_v41 = vcombine.high %v1593_v37, %v1601_v38  ;;  %v1602_v42 = vcombine.low %v1577_v35, %v1585_v36  ;;  %v1618_v43 = vcombine.low %v1593_v37, %v1601_v38 }
 0x6d3   : > { %v1617_v22 = vrot.slane %v1603_v40, %v2922_v49  ;;  %v1633_v44 = vrot.slane %v1619_v41, %v2922_v49  ;;  %v1610_v45 = vrot.slane %v1602_v42, %v2922_v49  ;;  %v1626_v46 = vrot.slane %v1618_v43, %v2922_v49 }
 0x6d5   : > { %v1636_v47 = vcombine.low %v1617_v22, %v1633_v44  ;;  %v1635_v48 = vcombine.high %v1610_v45, %v1626_v46  ;;  %v1637_v27 = vcombine.high %v1617_v22, %v1633_v44  ;;  %v1634_v26 = vcombine.low %v1610_v45, %v1626_v46 }
 0x6d7   : > { %1643 = vrot.lane.b32.xlu1 %v1636_v47, %s2609_s12  ;;  %1639 = vrot.lane.b32.xlu0 %v1635_v48, %s2610_s22  ;;  %s2612_s12 = smov [#allocation11]  }
 0x6d8   : > { %s2492_s22 = sshll.u32 %s2612_s12, 4  ;;  %s2493_s22 = int_to_ptr.vmem [resolvable:$false] %s2492_s22 }
 0x6d9   : > { %s2494_s21 = scalar_lea.vmem %s2493_s22, 512  ;;  %p2495_p8 = scmp.lt.s32.totalorder %s3105_s25, %s2493_s22 }
 0x6da   : > { %p2496_p11 = scmp.lt.s32.totalorder %s2494_s21, %s2488_s18 }
 0x6db   : > { %1647 = vrot.lane.b32.xlu0 %v1637_v27, %s2611_s13 }
 0x6dc   : > { %p2497_p13 = por %p2496_p11, %p2495_p8 }
 0x6de   : > { %p2498_p1 = pnand %p2497_p13, %p2491_p7 }
 0x749   : > { %v1640_v39 = vpop.permute.xlu0 %1639  ;;  %v1644_v28 = vpop.permute.xlu1 %1643 }
 0x74a   : > { %v1650_v52 = vsel %vm1079_vm2, %v1634_v26, %v1640_v39 }
 0x74b   : > { %v1652_v54 = vsel %vm1651_vm5, %v1650_v52, %v1644_v28 }
 0x74d   : > { %v1648_v53 = vpop.permute.xlu0 %1647 }
 0x74e   : > { %v1654_v55 = vsel %vm1653_vm6, %v1652_v54, %v1648_v53 }
 0x74f   : > { %v1655_v49 = vpack.c.bf16 %v1654_v55, %v1654_v55 }
 0x751   : > { %2225 = vmatmul.mubr.msk.bf16.vlgmr.msra.gmra.mrb[16].mxu1 %vm529_vm0, %v1655_v49 }
 0x752   : > { %2244 = vmatprep.mubr.msk.bf16.mxu1 %vm2601_vm1, %v2600_v8  ;;  %2237 = vmatpush3.bf16.msra.mxu1 %v2352_v5 }
 0x753   : > { %2238 = vmatprep.subr.bf16.mxu1 %v2600_v8 }
 0x756   : > { %2239 = vmatpush3.bf16.msra.mxu1 %v2353_v6 }
 0x757   : > { %2240 = vmatprep.subr.bf16.mxu1 %v2600_v8 }
 0x75a   : > { %2241 = vmatpush3.bf16.msra.mxu1 %v2354_v18 }
 0x75b   : > { %2242 = vmatprep.subr.bf16.mxu1 %v2600_v8 }
 0x75e   : > { %2243 = vmatpush3.bf16.msra.mxu1 %v2355_v19 }
 0x824   : > { %v1716_v50 = vpop.f32.mrb[16].mxu1 }
 0x825   : > { %v1717_v51 = vadd.f32 %v2110_v56, %v1716_v50  ;;  %v2226_v57 = vpop.f32.mrb[17].mxu1 }
 0x826   : > { %v1719_v58 = vpop.f32.mrb[18].mxu1 }
 0x827   : > { %v3071_v59 = vadd.f32 %v1717_v51, %v2864_v0  ;;  %v2227_v60 = vpop.f32.mrb[19].mxu1  ;;  %v2351_v0 = vld [vmem:[%s3200_s9 + $0x8] sm:$0xff]  }
 0x828   : > { %2231 = vmatpush3.bf16.msra.mxu0 %v2351_v0 }
 0x829   : > { %v1725_v61 = vsel %vm529_vm0, %v3071_v59, 0.0 }
 0x82a   : > { %1726 = vadd.xlane.f32.xlu1 %v1725_v61 }
 0x8b7   : > { %v1727_v62 = vpop.xlane.xlu1 %1726 }
 0x8b8   : > { %v1728_v63 = vmul.f32 0.03125, %v1727_v62 }
 0x8ba   : > { %v1729_v1 = vsub.f32 %v3071_v59, %v1728_v63 }
 0x8bc   : > { %v1730_v2 = vmul.f32 %v1729_v1, %v1729_v1 }
 0x8be   : > { %v1731_v3 = vsel %vm529_vm0, %v1730_v2, 0.0 }
 0x8bf   : > { %1732 = vadd.xlane.f32.xlu0 %v1731_v3 }
 0x94c   : > { %v1733_v7 = vpop.xlane.xlu0 %1732 }
 0x94d   : > { %v1734_v9 = vmul.f32 0.03125, %v1733_v7 }
 0x94f   : > { %v1735_v10 = vadd.f32 1e-05, %v1734_v9 }
 0x951   : > { %2374 = vrsqrt.f32 %v1735_v10 }
 0x95b   : > { %v2375_v11 = vpop.eup %2374 }
 0x95c   : > { %v1737_v13 = vmul.f32 %v2375_v11, %v1729_v1 }
 0x95e   : > { %v1744_v15 = vmul.f32 %v2114_v12, %v1737_v13 }
 0x960   : > { %v1751_v16 = vadd.f32 %v2115_v14, %v1744_v15 }
 0x962   : > { %v1752_v17 = vpack.c.bf16 %v1751_v16, %v1751_v16 }
 0x964   : > { %2233 = vmatmul.mubr.msk.bf16.vlgmr.msra.gmra.mrb[20].mxu0 %vm529_vm0, %v1752_v17 }
 0xa37   : > { %v1813_v21 = vpop.f32.mrb[20].mxu0 }
 0xa38   : > { %v1814_v23 = vadd.f32 %v2116_v20, %v1813_v21  ;;  %v2234_v24 = vpop.f32.mrb[21].mxu0 }
 0xa39   : > { %v1816_v25 = vpop.f32.mrb[22].mxu0 }
 0xa3a   : > { %v1819_v29 = vmax.f32 %v1814_v23, 0.0  ;;  %v2235_v30 = vpop.f32.mrb[23].mxu0 }
 0xa3c   : > { %v1820_v31 = vpack.c.bf16 %v1819_v29, %v1819_v29 }
 0xa3e   : > { %2245 = vmatmul.mubr.msk.bf16.vlgmr.msra.gmra.mrb[20].mxu1 %vm1860_vm7, %v1820_v31 }
 0xa3f   : > { %2501 = shalt.err (!%p2498_p1)
}
 0xa40   : > { %s2502_s13 = scalar_lea.hbm %s3110_s29, 256  ;;  %s2506_s20 = scalar_lea.hbm %s3205_s14, 512 }
 0xa41   : > { %p2503_p0 = scmp.ne.s32.totalorder %s3110_s29, %s2502_s13  ;;  %p2507_p9 = scmp.lt.u32.totalorder %s3110_s29, %s3205_s14 }
 0xa42   : > { %p2508_p12 = scmp.lt.u32.totalorder %s2506_s20, %s2502_s13  ;;  %p2510_p2 = scmp.lt.u32.totalorder %s2502_s13, %s3110_s29 }
 0xa43   : > { %p2504_p6 = pnand %p2503_p0, %p3238_p3 }
 0xa44   : > { %p2509_p10 = por %p2508_p12, %p2507_p9 }
 0xa45   : > { %p2505_p5 = pneg %p2504_p6 }
 0xa46   : > { %p2511_p4 = por %p2510_p2, %p2509_p10 }
 0xa48   : > { %p2512_p7 = pnand %p2511_p4, %p2505_p5 }
 0xa4a   : > { %2515 = shalt.err (!%p2512_p7)
}
 0xa4b   : > { %s2613_s18 = smov 4   ;;  %s2085_s12 = sshll.u32 %s2995_s16, 3 }
 0xa4c   : > { %2265 = dma.vmem_to_hbm [thread:$0]  (%p3238_p3), %s3105_s25, 256, %s3110_s29, %s1912_s27, %s2608_s28, %s2608_s28, %s2613_s18  }
 0xa4d   : > { %s3239_s13 = sld [smem:[#allocation25_spill]]  ;;  %s2128_s19 = sshll.u32 %s2711_s17, 7 }
 0xa4e   : > { %s513_s24 = scalar_lea.vmem [#allocation10], %s2085_s12  ;;  %s3240_s0 = sld [smem:[#allocation26_spill]] }
 0xa4f   : > { %s1925_s20 = sshll.u32 %s513_s24, 4  ;;  %s1907_s17 = scalar_lea.sflag [#allocation4], %s2995_s16  ;;  %s3149_s20 = int_to_ptr.vmem [resolvable:$true] %s1925_s20 }
 0xa50   : > { %s2516_s25 = scalar_lea.vmem %s3149_s20, 128  ;;  %s2614_s29 = smov [#allocation10]  }
 0xa51   : > { %p2517_p8 = scmp.ne.s32.totalorder %s3149_s20, %s2516_s25  ;;  %s2520_s27 = sshll.u32 %s2614_s29, 4  ;;  %s2521_s27 = int_to_ptr.vmem [resolvable:$false] %s2520_s27 }
 0xa52   : > { %s2522_s18 = scalar_lea.vmem %s2521_s27, 256  ;;  %p2523_p1 = scmp.lt.s32.totalorder %s3149_s20, %s2521_s27 }
 0xa53   : > { %v2120_v8 = vld [vmem:[%s3239_s13] ss:$0 sm:$0xff]  ;;  %p2518_p11 = pnand %p2517_p8, %p3238_p3  ;;  %p2524_p0 = scmp.lt.s32.totalorder %s2522_s18, %s2516_s25 }
 0xa54   : > { %s3147_s28 = scalar_lea.hbm %s3240_s0, %s2128_s19 }
 0xa55   : > { %p2519_p13 = pneg %p2518_p11  ;;  %p2525_p6 = por %p2524_p0, %p2523_p1 }
 0xa57   : > { %p2526_p5 = pnand %p2525_p6, %p2519_p13 }
 0xb11   : > { %v1898_v32 = vpop.f32.mrb[20].mxu1 }
 0xb12   : > { %v1899_v33 = vadd.f32 %v2120_v8, %v1898_v32  ;;  %v2246_v34 = vpop.f32.mrb[21].mxu1 }
 0xb13   : > { %v1901_v35 = vpop.f32.mrb[22].mxu1 }
 0xb14   : > { %v1904_v36 = vadd.f32 %v1899_v33, %v3071_v59  ;;  %v2247_v37 = vpop.f32.mrb[23].mxu1 }
 0xb16   : > { %1905 = vst.msk [vmem:[%s513_s24] sm:$0xff] %vm529_vm0, %v1904_v36 }
 0xb17   : > { %2529 = shalt.err (!%p2526_p5)
}
 0xb18   : > { %s2530_s16 = scalar_lea.hbm %s3147_s28, 128  ;;  %s2534_s21 = scalar_lea.hbm %s3240_s0, 256 }
 0xb19   : > { %p2531_p9 = scmp.ne.s32.totalorder %s3147_s28, %s2530_s16  ;;  %p2535_p2 = scmp.lt.u32.totalorder %s3147_s28, %s3240_s0 }
 0xb1a   : > { %p2536_p4 = scmp.lt.u32.totalorder %s2534_s21, %s2530_s16  ;;  %p2538_p8 = scmp.lt.u32.totalorder %s2530_s16, %s3147_s28 }
 0xb1b   : > { %p2532_p12 = pnand %p2531_p9, %p3238_p3 }
 0xb1c   : > { %p2537_p7 = por %p2536_p4, %p2535_p2 }
 0xb1d   : > { %p2533_p10 = pneg %p2532_p12 }
 0xb1e   : > { %p2539_p11 = por %p2538_p8, %p2537_p7 }
 0xb20   : > { %p2540_p13 = pnand %p2539_p11, %p2533_p10 }
 0xb22   : > { %2543 = shalt.err (!%p2540_p13)
}
 0xb23   : > { %2264 = dma.vmem_to_hbm [thread:$0]  (%p3238_p3), %s3149_s20, 128, %s3147_s28, %s1907_s17  }
 0xb24 PF: > { %s3241_s24 = sld [smem:[#allocation20_spill]]  ;;  %s3242_s26 = sld [smem:[#allocation18_spill]] }
 0xb25   : > { %s3243_s15 = sld [smem:[#allocation23_spill]] }
 0xb2a   : > { %p2296_p1 = scmp.ge.s32.totalorder %s3241_s24, 2  ;;  %s1953_s25 = sand.u32 1, %s3242_s26  }
 0xb2b   : > { %p3244_p0 = scmp.ne.s32.totalorder %s3243_s15, 0  ;;  %s1954_s29 = scalar_lea.sflag [#allocation4], %s1953_s25 }
 0xb2d   : > { %p2282_p6 = pnand %p2296_p1, %p3244_p0 }
 0xb2f   : > { %2573 = dma.done.wait (!%p2282_p6), %s1954_s29, 128  }
 0xb30   : > { %2575 = vsyncadd (!%p2282_p6), %s1954_s29, 4294967168  ;;  %s1963_s27 = scalar_lea.sflag [#allocation12], %s1953_s25 }
 0xb31   : > { %2577 = dma.done.wait (!%p2282_p6), %s1963_s27, 256  }
 0xb32   : > { %2579 = vsyncadd (!%p2282_p6), %s1963_s27, 4294967040  ;;  %s3245_s16 = sld [smem:[#allocation21_spill]]  ;;  %s3246_s23 = sld [smem:[#allocation19_spill]] }
 0xb33   : > { %s3247_s15 = sld [smem:[#allocation22_spill]]  ;;  %s3248_s29 = smov %s2586_s30 }
 0xb38   : > { %p31_p3 = scmp.ge.s32.totalorder %s3245_s16, 4   ;;  %s3249_s30 = smov %s3246_s23 }
 0xb3a   :  { %33 = sbr.rel (!%p31_p3) target bundleno = 12 (0xc), region = 141 }
 0xb41   :  { %1968 = vsyncpa [#allocation3], 1 }
 0xb42   :  { %1970 = vsyncpa [#allocation3 + $0x1], 1 }
 0xb43   :  { %1971 = vsyncpa [#allocation6], 1 }
 0xb44   :  { %1972 = vsyncpa [#allocation9], 1 }
 0xb45   :  { %1973 = vsyncpa [#allocation4], 1 }
 0xb46   :  { %1975 = vsyncpa [#allocation4 + $0x1], 1 }
 0xb47   :  { %1976 = vsyncpa [#allocation12], 1 }
 0xb48   :  { %1978 = vsyncpa [#allocation12 + $0x1], 1 }

</bundles_post_ra>
